<compile_context>
chip_gen: v7x
topology: tpu7x:2x2x1
jax: 0.10.0
libtpu: 0.0.40
codegen_flags: <defaults>
</compile_context>

<pallas_src>
import jax
import jax.numpy as jnp
from jax.experimental import pallas as pl
from jax.experimental.pallas import tpu as pltpu


# ----------------------------- small helpers --------------------------------
def _cdiv(a, b):
    return (a + b - 1) // b


def _round_up(x, m):
    return _cdiv(x, m) * m


def _device_kind():
    try:
        return jax.devices()[0].device_kind.lower()
    except Exception:
        return ""


def _num_tensorcores():
    # v7x exposes 2 TensorCores behind one device; v5e/v6e have 1.
    return 2 if "v7" in _device_kind() else 1


def _prefer_mxu_layer4():
    # v6e/v7x are VPU-bound for this kernel -> offload layer 4 to the MXU.
    # v5e is MXU-bound -> keep layer 4 on the VPU/XLU.
    return "v5" not in _device_kind()


# ------------------------------- kernels -------------------------------------
def _mlp_kernel_mxu4(z_ref, w1_ref, b1_ref, w2_ref, b2_ref, w3_ref, b3_ref,
                     w4_ref, b4_ref, o_ref):
    """v6e / v7x variant: layer 4 on the MXU, bf16 elementwise epilogues."""
    x = z_ref[...]                                        # (TM, 2) f32
    w1 = w1_ref[...]                                      # (2, Hp) f32 [in, out]

    # Layer 1: contraction dim is 2 -> VPU broadcast multiply-add.
    acc = x[:, 0:1] * w1[0:1, :] + x[:, 1:2] * w1[1:2, :] + b1_ref[...]
    h = jnp.maximum(acc.astype(jnp.bfloat16), 0.0)        # ReLU in bf16 (== cast(ReLU))

    # Layers 2 & 3: bf16 x bf16 MXU matmuls with f32 accumulation.
    acc = jnp.dot(h, w2_ref[...], preferred_element_type=jnp.float32) + b2_ref[...]
    h = jnp.maximum(acc.astype(jnp.bfloat16), 0.0)

    acc = jnp.dot(h, w3_ref[...], preferred_element_type=jnp.float32) + b3_ref[...]
    h = jnp.maximum(acc.astype(jnp.bfloat16), 0.0)

    # Layer 4 on the MXU: (Hp, 128) bf16 weight, only columns 0..1 nonzero.
    out = jnp.dot(h, w4_ref[...], preferred_element_type=jnp.float32)  # (TM, 128)
    o_ref[...] = (out[:, 0:2] + b4_ref[...]).astype(o_ref.dtype)


def _mlp_kernel_vpu4(z_ref, w1_ref, b1_ref, w2_ref, b2_ref, w3_ref, b3_ref,
                     w4t_ref, b4_ref, o_ref):
    """v5e variant: layer 4 on VPU/XLU, f32 elementwise (no bf16 VALU)."""
    x = z_ref[...]                                        # (TM, 2) f32
    w1 = w1_ref[...]                                      # (2, Hp) f32 [in, out]

    h = x[:, 0:1] * w1[0:1, :] + x[:, 1:2] * w1[1:2, :] + b1_ref[...]
    h = jnp.maximum(h, 0.0)

    h = jnp.dot(h.astype(jnp.bfloat16), w2_ref[...],
                preferred_element_type=jnp.float32) + b2_ref[...]
    h = jnp.maximum(h, 0.0)

    h = jnp.dot(h.astype(jnp.bfloat16), w3_ref[...],
                preferred_element_type=jnp.float32) + b3_ref[...]
    h = jnp.maximum(h, 0.0)

    # Layer 4: two VPU multiplies + lane (XLU) reductions; direct slice stores
    # (no lane-axis concatenation).
    w4t = w4t_ref[...]                                    # (2, Hp) f32 [out, in]
    c0 = jnp.sum(h * w4t[0:1, :], axis=-1, keepdims=True)   # (TM, 1)
    c1 = jnp.sum(h * w4t[1:2, :], axis=-1, keepdims=True)   # (TM, 1)
    o_ref[:, 0:1] = (c0 + b4_ref[0:1, 0:1]).astype(o_ref.dtype)
    o_ref[:, 1:2] = (c1 + b4_ref[0:1, 1:2]).astype(o_ref.dtype)


# ------------------------------ host wrapper ---------------------------------
def _choose_batch_tiling(B, block_rows, num_cores):
    grid = _cdiv(B, block_rows)
    if num_cores > 1 and B >= 8 * num_cores:
        grid = _round_up(grid, num_cores)      # keep every v7x TC busy
    grid = max(1, min(grid, _cdiv(B, 8)))      # never shrink tiles below 8 rows
    tm = _round_up(_cdiv(B, grid), 8)
    return grid, tm


def generator_forward(z, kparams, *, block_rows=1024, num_cores=None):
    """z: [B, 2] float32.  kparams: dict from prepare_kernel_params."""
    B = z.shape[0]
    if num_cores is None:
        num_cores = _num_tensorcores()
    grid, tm = _choose_batch_tiling(B, block_rows, num_cores)
    b_pad = grid * tm
    if b_pad != B:
        z = jnp.pad(z, ((0, b_pad - B), (0, 0)))

    # Kernel variant is implied by the w4 layout produced by prepare_kernel_params.
    use_mxu_l4 = kparams["w4"].shape[0] != 2
    kernel = _mlp_kernel_mxu4 if use_mxu_l4 else _mlp_kernel_vpu4

    w1, b1 = kparams["w1"], kparams["b1"]
    w2, b2 = kparams["w2"], kparams["b2"]
    w3, b3 = kparams["w3"], kparams["b3"]
    w4, b4 = kparams["w4"], kparams["b4"]

    # Constant index_map => weights/biases stay resident in VMEM across the
    # batch grid (no per-tile re-DMA).
    def const(a):
        return pl.BlockSpec(a.shape, lambda i: (0, 0))

    out = pl.pallas_call(
        kernel,
        out_shape=jax.ShapeDtypeStruct((b_pad, 2), z.dtype),
        grid=(grid,),
        in_specs=[pl.BlockSpec((tm, 2), lambda i: (i, 0)),
                  const(w1), const(b1),
                  const(w2), const(b2),
                  const(w3), const(b3),
                  const(w4), const(b4)],
        out_specs=pl.BlockSpec((tm, 2), lambda i: (i, 0)),
        compiler_params=pltpu.CompilerParams(
            dimension_semantics=("parallel",)),
    )(z, w1, b1, w2, b2, w3, b3, w4, b4)
    return out[:B]


# --------------------------- parameter handling -------------------------------
def init_params(key, h_dim=400):
    """PyTorch-native layout (w: [out, in], b: [out]), fan-in uniform init."""
    def uniform(k, shape, fan_in):
        bound = float(fan_in) ** -0.5
        return jax.random.uniform(k, shape, jnp.float32, minval=-bound, maxval=bound)

    ks = jax.random.split(key, 8)
    return {
        "w1": uniform(ks[0], (h_dim, 2), 2),       "b1": uniform(ks[1], (h_dim,), 2),
        "w2": uniform(ks[2], (h_dim, h_dim), h_dim), "b2": uniform(ks[3], (h_dim,), h_dim),
        "w3": uniform(ks[4], (h_dim, h_dim), h_dim), "b3": uniform(ks[5], (h_dim,), h_dim),
        "w4": uniform(ks[6], (2, h_dim), h_dim),     "b4": uniform(ks[7], (2,), h_dim),
    }


def prepare_kernel_params(tp, *, use_mxu_l4, lane=128):
    """Pad hidden dim to a lane multiple (400 -> 512), transpose to [in, out],
    and cast the big weights to bf16 for the MXU.  Zero padding + ReLU keeps
    the original semantics exactly."""
    H = tp["w1"].shape[0]
    Hp = _round_up(H, lane)
    ph = Hp - H
    f32, bf16 = jnp.float32, jnp.bfloat16

    w1 = jnp.pad(tp["w1"].astype(f32).T, ((0, 0), (0, ph)))              # (2, Hp)
    b1 = jnp.pad(tp["b1"].astype(f32).reshape(1, H), ((0, 0), (0, ph)))  # (1, Hp)
    w2 = jnp.pad(tp["w2"].astype(f32).T, ((0, ph), (0, ph))).astype(bf16)  # (Hp, Hp)
    b2 = jnp.pad(tp["b2"].astype(f32).reshape(1, H), ((0, 0), (0, ph)))
    w3 = jnp.pad(tp["w3"].astype(f32).T, ((0, ph), (0, ph))).astype(bf16)
    b3 = jnp.pad(tp["b3"].astype(f32).reshape(1, H), ((0, 0), (0, ph)))
    b4 = tp["b4"].astype(f32).reshape(1, 2)

    if use_mxu_l4:
        # (Hp, 128) bf16, only the first two output columns are nonzero.
        w4 = jnp.zeros((Hp, lane), bf16).at[:H, :2].set(tp["w4"].T.astype(bf16))
    else:
        # PyTorch [out, in] orientation: lane-dense rows for the VPU/XLU path.
        w4 = jnp.pad(tp["w4"].astype(f32), ((0, 0), (0, ph)))             # (2, Hp)

    return dict(w1=w1, b1=b1, w2=w2, b2=b2, w3=w3, b3=b3, w4=w4, b4=b4)


def _reference_forward(z, tp):
    """Plain-JAX reference mirroring the kernel's bf16 matmul dtype choices."""
    h = jnp.maximum(z @ tp["w1"].T + tp["b1"], 0.0)
    h = jnp.maximum(
        jnp.dot(h.astype(jnp.bfloat16), tp["w2"].T.astype(jnp.bfloat16),
                preferred_element_type=jnp.float32) + tp["b2"], 0.0)
    h = jnp.maximum(
        jnp.dot(h.astype(jnp.bfloat16), tp["w3"].T.astype(jnp.bfloat16),
                preferred_element_type=jnp.float32) + tp["b3"], 0.0)
    return h @ tp["w4"].T + tp["b4"]


# ----------------------------------- main -------------------------------------
if __name__ == "__main__":
    key = jax.random.PRNGKey(0)
    k_params, k_z1, k_z2 = jax.random.split(key, 3)

    H_DIM = 400          # same default as the PyTorch module
    torch_params = init_params(k_params, h_dim=H_DIM)
    use_mxu_l4 = _prefer_mxu_layer4()
    kparams = prepare_kernel_params(torch_params, use_mxu_l4=use_mxu_l4)

    # Small batch (single grid step, padded batch rows).
    z_small = jax.random.normal(k_z1, (8, 2), jnp.float32)
    out_small = jax.block_until_ready(generator_forward(z_small, kparams))
    ref_small = _reference_forward(z_small, torch_params)
    assert out_small.shape == (8, 2)
    assert jnp.allclose(out_small, ref_small, atol=1e-2, rtol=1e-2), \
        "small-batch mismatch vs JAX reference"

    # Larger, non-multiple-of-8 batch exercising the multi-step "parallel"
    # batch grid, bounded padding, and resident-weight BlockSpecs.
    z_big = jax.random.normal(k_z2, (1000, 2), jnp.float32)
    out_big = jax.block_until_ready(
        generator_forward(z_big, kparams, block_rows=256))
    ref_big = _reference_forward(z_big, torch_params)
    assert out_big.shape == (1000, 2)
    assert jnp.allclose(out_big, ref_big, atol=1e-2, rtol=1e-2), \
        "large-batch mismatch vs JAX reference"

    print("KERNEL_OK")
</pallas_src>

<mosaic_0001>
module attributes {stable_mosaic.version = 11 : i64} {
  func.func @_mlp_kernel_mxu4(%arg0: i32, %arg1: memref<8x2xf32, #tpu.memory_space<vmem>>, %arg2: memref<2x512xf32, #tpu.memory_space<vmem>>, %arg3: memref<1x512xf32, #tpu.memory_space<vmem>>, %arg4: memref<512x512xbf16, #tpu.memory_space<vmem>>, %arg5: memref<1x512xf32, #tpu.memory_space<vmem>>, %arg6: memref<512x512xbf16, #tpu.memory_space<vmem>>, %arg7: memref<1x512xf32, #tpu.memory_space<vmem>>, %arg8: memref<512x128xbf16, #tpu.memory_space<vmem>>, %arg9: memref<1x2xf32, #tpu.memory_space<vmem>>, %arg10: memref<8x2xf32, #tpu.memory_space<vmem>>) attributes {dimension_semantics = [#tpu.dimension_semantics<parallel>], iteration_bounds = array<i64: 1>, scalar_prefetch = 0 : i64, scratch_operands = 0 : i64, tpu.core_type = #tpu.core_type<tc>, window_params = [{transform_indices = @transform_0, window_bounds = array<i64: 8, 2>}, {pipeline_mode = #tpu.pipeline_mode<synchronous>, transform_indices = @transform_1, window_bounds = array<i64: 2, 512>}, {pipeline_mode = #tpu.pipeline_mode<synchronous>, transform_indices = @transform_2, window_bounds = array<i64: 1, 512>}, {pipeline_mode = #tpu.pipeline_mode<synchronous>, transform_indices = @transform_3, window_bounds = array<i64: 512, 512>}, {pipeline_mode = #tpu.pipeline_mode<synchronous>, transform_indices = @transform_4, window_bounds = array<i64: 1, 512>}, {pipeline_mode = #tpu.pipeline_mode<synchronous>, transform_indices = @transform_5, window_bounds = array<i64: 512, 512>}, {pipeline_mode = #tpu.pipeline_mode<synchronous>, transform_indices = @transform_6, window_bounds = array<i64: 1, 512>}, {pipeline_mode = #tpu.pipeline_mode<synchronous>, transform_indices = @transform_7, window_bounds = array<i64: 512, 128>}, {pipeline_mode = #tpu.pipeline_mode<synchronous>, transform_indices = @transform_8, window_bounds = array<i64: 1, 2>}, {transform_indices = @transform_9, window_bounds = array<i64: 8, 2>}]} {
    %c0 = arith.constant 0 : index
    %c0_0 = arith.constant 0 : index
    %0 = vector.load %arg1[%c0, %c0_0] : memref<8x2xf32, #tpu.memory_space<vmem>>, vector<8x2xf32>
    %c0_1 = arith.constant 0 : index
    %c0_2 = arith.constant 0 : index
    %1 = vector.load %arg2[%c0_1, %c0_2] : memref<2x512xf32, #tpu.memory_space<vmem>>, vector<2x512xf32>
    %2 = vector.extract_strided_slice %0 {offsets = [0, 0], sizes = [8, 1], strides = [1, 1]} : vector<8x2xf32> to vector<8x1xf32>
    %3 = vector.extract_strided_slice %1 {offsets = [0, 0], sizes = [1, 512], strides = [1, 1]} : vector<2x512xf32> to vector<1x512xf32>
    %4 = vector.broadcast %2 : vector<8x1xf32> to vector<8x512xf32>
    %5 = vector.broadcast %3 : vector<1x512xf32> to vector<8x512xf32>
    %6 = arith.mulf %4, %5 : vector<8x512xf32>
    %7 = vector.extract_strided_slice %0 {offsets = [0, 1], sizes = [8, 1], strides = [1, 1]} : vector<8x2xf32> to vector<8x1xf32>
    %8 = vector.extract_strided_slice %1 {offsets = [1, 0], sizes = [1, 512], strides = [1, 1]} : vector<2x512xf32> to vector<1x512xf32>
    %9 = vector.broadcast %7 : vector<8x1xf32> to vector<8x512xf32>
    %10 = vector.broadcast %8 : vector<1x512xf32> to vector<8x512xf32>
    %11 = arith.mulf %9, %10 : vector<8x512xf32>
    %12 = arith.addf %6, %11 : vector<8x512xf32>
    %c0_3 = arith.constant 0 : index
    %c0_4 = arith.constant 0 : index
    %13 = vector.load %arg3[%c0_3, %c0_4] : memref<1x512xf32, #tpu.memory_space<vmem>>, vector<1x512xf32>
    %14 = vector.broadcast %13 : vector<1x512xf32> to vector<8x512xf32>
    %15 = arith.addf %12, %14 : vector<8x512xf32>
    %16 = arith.truncf %15 : vector<8x512xf32> to vector<8x512xbf16>
    %cst = arith.constant 0.000000e+00 : bf16
    %17 = vector.broadcast %cst : bf16 to vector<8x512xbf16>
    %18 = arith.maximumf %16, %17 : vector<8x512xbf16>
    %c0_5 = arith.constant 0 : index
    %c0_6 = arith.constant 0 : index
    %19 = vector.load %arg4[%c0_5, %c0_6] : memref<512x512xbf16, #tpu.memory_space<vmem>>, vector<512x512xbf16>
    %cst_7 = arith.constant dense<0.000000e+00> : vector<8x512xf32>
    %20 = tpu.matmul %18, %19, %cst_7 {dimension_numbers = #tpu.dot_dimension_numbers<[1], [0], [0], [1], [0, 0, 1, 1], [], []>} : vector<8x512xbf16>, vector<512x512xbf16>, vector<8x512xf32> -> vector<8x512xf32>
    %c0_8 = arith.constant 0 : index
    %c0_9 = arith.constant 0 : index
    %21 = vector.load %arg5[%c0_8, %c0_9] : memref<1x512xf32, #tpu.memory_space<vmem>>, vector<1x512xf32>
    %22 = vector.broadcast %21 : vector<1x512xf32> to vector<8x512xf32>
    %23 = arith.addf %20, %22 : vector<8x512xf32>
    %24 = arith.truncf %23 : vector<8x512xf32> to vector<8x512xbf16>
    %cst_10 = arith.constant 0.000000e+00 : bf16
    %25 = vector.broadcast %cst_10 : bf16 to vector<8x512xbf16>
    %26 = arith.maximumf %24, %25 : vector<8x512xbf16>
    %c0_11 = arith.constant 0 : index
    %c0_12 = arith.constant 0 : index
    %27 = vector.load %arg6[%c0_11, %c0_12] : memref<512x512xbf16, #tpu.memory_space<vmem>>, vector<512x512xbf16>
    %cst_13 = arith.constant dense<0.000000e+00> : vector<8x512xf32>
    %28 = tpu.matmul %26, %27, %cst_13 {dimension_numbers = #tpu.dot_dimension_numbers<[1], [0], [0], [1], [0, 0, 1, 1], [], []>} : vector<8x512xbf16>, vector<512x512xbf16>, vector<8x512xf32> -> vector<8x512xf32>
    %c0_14 = arith.constant 0 : index
    %c0_15 = arith.constant 0 : index
    %29 = vector.load %arg7[%c0_14, %c0_15] : memref<1x512xf32, #tpu.memory_space<vmem>>, vector<1x512xf32>
    %30 = vector.broadcast %29 : vector<1x512xf32> to vector<8x512xf32>
    %31 = arith.addf %28, %30 : vector<8x512xf32>
    %32 = arith.truncf %31 : vector<8x512xf32> to vector<8x512xbf16>
    %cst_16 = arith.constant 0.000000e+00 : bf16
    %33 = vector.broadcast %cst_16 : bf16 to vector<8x512xbf16>
    %34 = arith.maximumf %32, %33 : vector<8x512xbf16>
    %c0_17 = arith.constant 0 : index
    %c0_18 = arith.constant 0 : index
    %35 = vector.load %arg8[%c0_17, %c0_18] : memref<512x128xbf16, #tpu.memory_space<vmem>>, vector<512x128xbf16>
    %cst_19 = arith.constant dense<0.000000e+00> : vector<8x128xf32>
    %36 = tpu.matmul %34, %35, %cst_19 {dimension_numbers = #tpu.dot_dimension_numbers<[1], [0], [0], [1], [0, 0, 1, 1], [], []>} : vector<8x512xbf16>, vector<512x128xbf16>, vector<8x128xf32> -> vector<8x128xf32>
    %37 = vector.extract_strided_slice %36 {offsets = [0, 0], sizes = [8, 2], strides = [1, 1]} : vector<8x128xf32> to vector<8x2xf32>
    %c0_20 = arith.constant 0 : index
    %c0_21 = arith.constant 0 : index
    %38 = vector.load %arg9[%c0_20, %c0_21] : memref<1x2xf32, #tpu.memory_space<vmem>>, vector<1x2xf32>
    %39 = vector.broadcast %38 : vector<1x2xf32> to vector<8x2xf32>
    %40 = arith.addf %37, %39 : vector<8x2xf32>
    %c0_22 = arith.constant 0 : index
    %c0_23 = arith.constant 0 : index
    %41 = vector.load %arg10[%c0_22, %c0_23] : memref<8x2xf32, #tpu.memory_space<vmem>>, vector<8x2xf32>
    tpu.vector_store %arg10[%c0_22, %c0_23], %40 {strides = array<i32>} : memref<8x2xf32, #tpu.memory_space<vmem>>, vector<8x2xf32>,
    return
  }
  func.func @transform_0(%arg0: i32) -> (i32, i32) {
    %c0_i32 = arith.constant 0 : i32
    %c0_i32_0 = arith.constant 0 : i32
    return %arg0, %c0_i32 : i32, i32
  }
  func.func @transform_1(%arg0: i32) -> (i32, i32) {
    %c0_i32 = arith.constant 0 : i32
    %c0_i32_0 = arith.constant 0 : i32
    %c0_i32_1 = arith.constant 0 : i32
    return %c0_i32, %c0_i32_0 : i32, i32
  }
  func.func @transform_2(%arg0: i32) -> (i32, i32) {
    %c0_i32 = arith.constant 0 : i32
    %c0_i32_0 = arith.constant 0 : i32
    %c0_i32_1 = arith.constant 0 : i32
    return %c0_i32, %c0_i32_0 : i32, i32
  }
  func.func @transform_3(%arg0: i32) -> (i32, i32) {
    %c0_i32 = arith.constant 0 : i32
    %c0_i32_0 = arith.constant 0 : i32
    %c0_i32_1 = arith.constant 0 : i32
    return %c0_i32, %c0_i32_0 : i32, i32
  }
  func.func @transform_4(%arg0: i32) -> (i32, i32) {
    %c0_i32 = arith.constant 0 : i32
    %c0_i32_0 = arith.constant 0 : i32
    %c0_i32_1 = arith.constant 0 : i32
    return %c0_i32, %c0_i32_0 : i32, i32
  }
  func.func @transform_5(%arg0: i32) -> (i32, i32) {
    %c0_i32 = arith.constant 0 : i32
    %c0_i32_0 = arith.constant 0 : i32
    %c0_i32_1 = arith.constant 0 : i32
    return %c0_i32, %c0_i32_0 : i32, i32
  }
  func.func @transform_6(%arg0: i32) -> (i32, i32) {
    %c0_i32 = arith.constant 0 : i32
    %c0_i32_0 = arith.constant 0 : i32
    %c0_i32_1 = arith.constant 0 : i32
    return %c0_i32, %c0_i32_0 : i32, i32
  }
  func.func @transform_7(%arg0: i32) -> (i32, i32) {
    %c0_i32 = arith.constant 0 : i32
    %c0_i32_0 = arith.constant 0 : i32
    %c0_i32_1 = arith.constant 0 : i32
    return %c0_i32, %c0_i32_0 : i32, i32
  }
  func.func @transform_8(%arg0: i32) -> (i32, i32) {
    %c0_i32 = arith.constant 0 : i32
    %c0_i32_0 = arith.constant 0 : i32
    %c0_i32_1 = arith.constant 0 : i32
    return %c0_i32, %c0_i32_0 : i32, i32
  }
  func.func @transform_9(%arg0: i32) -> (i32, i32) {
    %c0_i32 = arith.constant 0 : i32
    %c0_i32_0 = arith.constant 0 : i32
    return %arg0, %c0_i32 : i32, i32
  }
}

</mosaic_0001>

<bundles_post_ra>
// kernel: tpu_custom_call.1
= control target key start
LH: loop header
LB: loop body
LE: loop exit
PB: predicated region body
PF: predicated region fallthrough
CT: control target
= control target key end

     0   :  { %14 = vsyncpa [#allocation3], 0  ;;  %s3541_s0 = inlined_call_operand.vmem [shape: f32[8,2], index: 0, kind: input, shape index: {}]   ;;  %s3542_s1 = inlined_call_operand.vmem [shape: f32[2,512], index: 1, kind: input, shape index: {}]   ;;  %s3543_s2 = inlined_call_operand.vmem [shape: f32[1,512], index: 2, kind: input, shape index: {}]   ;;  %s3544_s3 = inlined_call_operand.hbm [shape: bf16[512,512], index: 3, kind: input, shape index: {}]   ;;  %s3545_s4 = inlined_call_operand.vmem [shape: f32[1,512], index: 4, kind: input, shape index: {}]   ;;  %s3546_s5 = inlined_call_operand.hbm [shape: bf16[512,512], index: 5, kind: input, shape index: {}]   ;;  %s3547_s6 = inlined_call_operand.vmem [shape: f32[1,512], index: 6, kind: input, shape index: {}]   ;;  %s3548_s7 = inlined_call_operand.hbm [shape: bf16[512,128], index: 7, kind: input, shape index: {}]   ;;  %s3549_s8 = inlined_call_operand.vmem [shape: f32[1,2], index: 8, kind: input, shape index: {}]   ;;  %s3550_s9 = inlined_call_operand.vmem [shape: f32[8,2], index: 9, kind: output, shape index: {}]  }
   0x1   :  { %15 = vsyncpa [#allocation5], 0  ;;  %s3334_s30 = smov [#allocation4]   ;;  %s3335_s11 = smov [#allocation2]  }
   0x2   :  { %s41_s10 = sshll.u32 %s3334_s30, 4  ;;  %s27_s12 = sshll.u32 %s3335_s11, 4  ;;  %s42_s10 = int_to_ptr.vmem [resolvable:$true] %s41_s10  ;;  %s3393_s12 = int_to_ptr.vmem [resolvable:$true] %s27_s12 }
   0x3   :  { %s3264_s15 = scalar_lea.hbm %s3546_s5, 16384 }
   0x4   :  { %p3265_p0 = scmp.ne.s32.totalorder %s3546_s5, %s3264_s15  ;;  %p3268_p1 = scmp.lt.u32.totalorder %s3264_s15, %s3546_s5 }
   0x6   :  { %p3270_p2 = pnand %p3268_p1, %p3265_p0 }
   0x8   :  { %3273 = shalt.err (!%p3270_p2)
}
   0x9   :  { %s3274_s20 = scalar_lea.vmem %s42_s10, 16384  ;;  %p3279_p4 = scmp.lt.s32.totalorder %s42_s10, %s42_s10 }
   0xa   :  { %p3275_p3 = scmp.ne.s32.totalorder %s42_s10, %s3274_s20  ;;  %p3280_p5 = scmp.lt.s32.totalorder %s3274_s20, %s3274_s20 }
   0xc   :  { %p3281_p6 = por %p3280_p5, %p3279_p4 }
   0xe   :  { %p3282_p7 = pnand %p3281_p6, %p3275_p3 }
  0x10   :  { %3285 = shalt.err (!%p3282_p7)
}
  0x11   :  { %s3336_s21 = smov 256   ;;  %s3337_s22 = smov 16  }
  0x12   :  { %47 = dma.hbm_to_vmem [thread:$0]  %s3546_s5, 16384, %s42_s10, [#allocation5], %s3336_s21, %s3336_s21, %s3337_s22  }
  0x13   :  { %s3286_s27 = scalar_lea.hbm %s3544_s3, 16384 }
  0x14   :  { %p3287_p8 = scmp.ne.s32.totalorder %s3544_s3, %s3286_s27  ;;  %p3290_p9 = scmp.lt.u32.totalorder %s3286_s27, %s3544_s3 }
  0x16   :  { %p3292_p10 = pnand %p3290_p9, %p3287_p8 }
  0x18   :  { %3295 = shalt.err (!%p3292_p10)
}
  0x19   :  { %s3296_s13 = scalar_lea.vmem %s3393_s12, 16384  ;;  %p3301_p12 = scmp.lt.s32.totalorder %s3393_s12, %s3393_s12 }
  0x1a   :  { %p3297_p11 = scmp.ne.s32.totalorder %s3393_s12, %s3296_s13  ;;  %p3302_p13 = scmp.lt.s32.totalorder %s3296_s13, %s3296_s13 }
  0x1c   :  { %p3303_p0 = por %p3302_p13, %p3301_p12 }
  0x1e   :  { %p3304_p1 = pnand %p3303_p0, %p3297_p11 }
  0x20   :  { %3307 = shalt.err (!%p3304_p1)
}
  0x21   :  { %33 = dma.hbm_to_vmem [thread:$0]  %s3544_s3, 16384, %s3393_s12, [#allocation3], %s3336_s21, %s3336_s21, %s3337_s22  }
  0x22   :  { %s3338_s14 = smov [#allocation6]   ;;  %s3308_s18 = scalar_lea.hbm %s3548_s7, 4096 }
  0x23   :  { %s55_s15 = sshll.u32 %s3338_s14, 4  ;;  %p3309_p2 = scmp.ne.s32.totalorder %s3548_s7, %s3308_s18  ;;  %s56_s15 = int_to_ptr.vmem [resolvable:$true] %s55_s15 }
  0x24   :  { %p3312_p3 = scmp.lt.u32.totalorder %s3308_s18, %s3548_s7 }
  0x26   :  { %p3314_p4 = pnand %p3312_p3, %p3309_p2 }
  0x28   :  { %3317 = shalt.err (!%p3314_p4)
}
  0x29   :  { %s3318_s25 = scalar_lea.vmem %s56_s15, 4096  ;;  %p3323_p6 = scmp.lt.s32.totalorder %s56_s15, %s56_s15 }
  0x2a   :  { %p3319_p5 = scmp.ne.s32.totalorder %s56_s15, %s3318_s25  ;;  %p3324_p7 = scmp.lt.s32.totalorder %s3318_s25, %s3318_s25 }
  0x2c   :  { %p3325_p8 = por %p3324_p7, %p3323_p6 }
  0x2e   :  { %p3326_p9 = pnand %p3325_p8, %p3319_p5 }
  0x30   :  { %3329 = shalt.err (!%p3326_p9)
}
  0x31   :  { %s3339_s3 = smov 64   ;;  %s3340_s12 = smov 4  }
  0x32   :  { %61 = dma.hbm_to_vmem [thread:$0]  %s3548_s7, 4096, %s56_s15, [#allocation5], %s3339_s3, %s3339_s3, %s3340_s12  }
  0x33   :  { %3330 = dma.done.wait [#allocation3], 16384  }
  0x34   :  { %3331 = vsyncadd [#allocation3], 4294950912 }
  0x35   :  { %3332 = dma.done.wait [#allocation5], 20480  }
  0x36   :  { %3333 = vsyncadd [#allocation5], 4294946816  ;;  %v3341_v0 = vmov 0   ;;  %v74_v1 = vld [vmem:[%s3541_s0] sm:$0xff]  ;;  %v2850_v3 = vld [vmem:[#allocation2 + $0xc] ss:$16 sps:$4 sm:$0xff]   ;;  %v82_v30 = vlaneseq }
  0x37   :  { %2846 = vset.pattern.permute.xlu0 %v3341_v0  ;;  %v2848_v2 = vld [vmem:[#allocation2 + $0x4] ss:$16 sps:$4 sm:$0xff]   ;;  %v2852_v4 = vld [vmem:[#allocation2] ss:$16 sps:$4 sm:$0xff]   ;;  %v2853_v5 = vld [vmem:[#allocation2 + $0x8] ss:$16 sps:$4 sm:$0xff]   ;;  %1076 = vmatprep.subr.bf16.mxu1 %v2850_v3 }
  0x38   :  { %78 = vperm.xlu0 %2846, %v74_v1   ;;  %994 = vmatprep.subr.bf16.mxu0 %v2848_v2  ;;  %v2854_v6 = vld [vmem:[#allocation2 + $0x24] ss:$16 sps:$4 sm:$0xff]   ;;  %v2856_v7 = vld [vmem:[#allocation2 + $0x2c] ss:$16 sps:$4 sm:$0xff]   ;;  %v3342_v8 = vmov 1   ;;  %v3440_v34 = vshrl.u32 %v82_v30, 7 }
  0x39   :  { %995 = vmatpush1.bf16.msra.mxu0 %v2852_v4  ;;  %1077 = vmatpush1.bf16.msra.mxu1 %v2853_v5  ;;  %v2858_v9 = vld [vmem:[#allocation2 + $0x20] ss:$16 sps:$4 sm:$0xff]   ;;  %v2859_v10 = vld [vmem:[#allocation2 + $0x28] ss:$16 sps:$4 sm:$0xff]   ;;  %v2860_v11 = vld [vmem:[#allocation2 + $0x44] ss:$16 sps:$4 sm:$0xff]  }
  0x3a   :  { %996 = vmatprep.subr.bf16.mxu0 %v2854_v6  ;;  %1078 = vmatprep.subr.bf16.mxu1 %v2856_v7  ;;  %v2862_v12 = vld [vmem:[#allocation2 + $0x4c] ss:$16 sps:$4 sm:$0xff]   ;;  %v2864_v13 = vld [vmem:[#allocation2 + $0x40] ss:$16 sps:$4 sm:$0xff]   ;;  %v2865_v14 = vld [vmem:[#allocation2 + $0x48] ss:$16 sps:$4 sm:$0xff]  }
  0x3b   :  { %v2866_v15 = vld [vmem:[#allocation2 + $0x64] ss:$16 sps:$4 sm:$0xff]   ;;  %v2868_v16 = vld [vmem:[#allocation2 + $0x6c] ss:$16 sps:$4 sm:$0xff]   ;;  %v2870_v17 = vld [vmem:[#allocation2 + $0x60] ss:$16 sps:$4 sm:$0xff]  }
  0x3c   :  { %2847 = vset.pattern.permute.xlu0 %v3342_v8  ;;  %v2871_v18 = vld [vmem:[#allocation2 + $0x68] ss:$16 sps:$4 sm:$0xff]   ;;  %v2872_v19 = vld [vmem:[#allocation2 + $0x84] ss:$16 sps:$4 sm:$0xff]   ;;  %v2874_v20 = vld [vmem:[#allocation2 + $0x8c] ss:$16 sps:$4 sm:$0xff]  }
  0x3d   :  { %123 = vperm.xlu0 %2847, %v74_v1   ;;  %997 = vmatpush1.bf16.msra.mxu0 %v2858_v9  ;;  %v2876_v21 = vld [vmem:[#allocation2 + $0x80] ss:$16 sps:$4 sm:$0xff]   ;;  %v2877_v22 = vld [vmem:[#allocation2 + $0x88] ss:$16 sps:$4 sm:$0xff]   ;;  %v2878_v23 = vld [vmem:[#allocation2 + $0xa4] ss:$16 sps:$4 sm:$0xff]  }
  0x3e   :  { %1079 = vmatpush1.bf16.msra.mxu1 %v2859_v10  ;;  %998 = vmatprep.subr.bf16.mxu0 %v2860_v11  ;;  %v2880_v24 = vld [vmem:[#allocation2 + $0xac] ss:$16 sps:$4 sm:$0xff]   ;;  %v2882_v25 = vld [vmem:[#allocation2 + $0xa0] ss:$16 sps:$4 sm:$0xff]   ;;  %v2883_v26 = vld [vmem:[#allocation2 + $0xa8] ss:$16 sps:$4 sm:$0xff]  }
  0x3f   :  { %1080 = vmatprep.subr.bf16.mxu1 %v2862_v12  ;;  %v2884_v27 = vld [vmem:[#allocation2 + $0xc4] ss:$16 sps:$4 sm:$0xff]   ;;  %v2886_v28 = vld [vmem:[#allocation2 + $0xcc] ss:$16 sps:$4 sm:$0xff]   ;;  %v2888_v29 = vld [vmem:[#allocation2 + $0xc0] ss:$16 sps:$4 sm:$0xff]  }
  0x40   :  { %v2889_v31 = vld [vmem:[#allocation2 + $0xc8] ss:$16 sps:$4 sm:$0xff]   ;;  %v2890_v32 = vld [vmem:[#allocation2 + $0xe4] ss:$16 sps:$4 sm:$0xff]   ;;  %v2892_v33 = vld [vmem:[#allocation2 + $0xec] ss:$16 sps:$4 sm:$0xff]  }
  0x41   :  { %999 = vmatpush1.bf16.msra.mxu0 %v2864_v13  ;;  %v2894_v35 = vld [vmem:[#allocation2 + $0xe0] ss:$16 sps:$4 sm:$0xff]   ;;  %v2895_v36 = vld [vmem:[#allocation2 + $0xe8] ss:$16 sps:$4 sm:$0xff]   ;;  %v2896_v37 = vld [vmem:[#allocation2 + $0x104] ss:$16 sps:$4 sm:$0xff]  }
  0x42   :  { %1081 = vmatpush1.bf16.msra.mxu1 %v2865_v14  ;;  %1000 = vmatprep.subr.bf16.mxu0 %v2866_v15  ;;  %v2898_v38 = vld [vmem:[#allocation2 + $0x10c] ss:$16 sps:$4 sm:$0xff]   ;;  %v2900_v39 = vld [vmem:[#allocation2 + $0x100] ss:$16 sps:$4 sm:$0xff]   ;;  %v92_v40 = vsub.s32 4, %v3440_v34  ;;  %v136_v42 = vsub.s32 5, %v3440_v34 }
  0x43   :  { %1082 = vmatprep.subr.bf16.mxu1 %v2868_v16  ;;  %v2901_v41 = vld [vmem:[#allocation2 + $0x108] ss:$16 sps:$4 sm:$0xff]   ;;  %v2902_v43 = vld [vmem:[#allocation2 + $0x124] ss:$16 sps:$4 sm:$0xff]   ;;  %v2904_v44 = vld [vmem:[#allocation2 + $0x12c] ss:$16 sps:$4 sm:$0xff]  }
  0x44   :  { %v3447_v45 = vld [vmem:[%s3542_s1] sm:$0xff]  ;;  %v2907_v49 = vld [vmem:[#allocation2 + $0x128] ss:$16 sps:$4 sm:$0xff]   ;;  %v2910_v51 = vld [vmem:[#allocation2 + $0x14c] ss:$16 sps:$4 sm:$0xff]   ;;  %v3456_v13 = vsub.s32 0, %v3440_v34 }
  0x45   :  { %1001 = vmatpush1.bf16.msra.mxu0 %v2870_v17  ;;  %v3450_v46 = vrot.slane %v3447_v45, %v92_v40  ;;  %v2906_v47 = vld [vmem:[#allocation2 + $0x120] ss:$16 sps:$4 sm:$0xff]   ;;  %v3453_v48 = vrot.slane %v3447_v45, %v136_v42  ;;  %v2908_v50 = vld [vmem:[#allocation2 + $0x144] ss:$16 sps:$4 sm:$0xff]   ;;  %v2913_v53 = vld [vmem:[#allocation2 + $0x148] ss:$16 sps:$4 sm:$0xff]  }
  0x46   :  { %1083 = vmatpush1.bf16.msra.mxu1 %v2871_v18  ;;  %1002 = vmatprep.subr.bf16.mxu0 %v2872_v19  ;;  %v2912_v52 = vld [vmem:[#allocation2 + $0x140] ss:$16 sps:$4 sm:$0xff]   ;;  %v2914_v54 = vld [vmem:[#allocation2 + $0x164] ss:$16 sps:$4 sm:$0xff]   ;;  %v2916_v55 = vld [vmem:[#allocation2 + $0x16c] ss:$16 sps:$4 sm:$0xff]   ;;  %v85_v19 = vrot.slane %v3447_v45, %v3456_v13 }
  0x47   :  { %1084 = vmatprep.subr.bf16.mxu1 %v2874_v20  ;;  %v2918_v56 = vld [vmem:[#allocation2 + $0x160] ss:$16 sps:$4 sm:$0xff]   ;;  %v2919_v57 = vld [vmem:[#allocation2 + $0x168] ss:$16 sps:$4 sm:$0xff]   ;;  %v2920_v58 = vld [vmem:[#allocation2 + $0x184] ss:$16 sps:$4 sm:$0xff]  }
  0x48   :  { %v2922_v59 = vld [vmem:[#allocation2 + $0x18c] ss:$16 sps:$4 sm:$0xff]   ;;  %v2924_v60 = vld [vmem:[#allocation2 + $0x180] ss:$16 sps:$4 sm:$0xff]   ;;  %v2925_v61 = vld [vmem:[#allocation2 + $0x188] ss:$16 sps:$4 sm:$0xff]  }
  0x49   :  { %1003 = vmatpush1.bf16.msra.mxu0 %v2876_v21  ;;  %v2926_v62 = vld [vmem:[#allocation2 + $0x1a4] ss:$16 sps:$4 sm:$0xff]   ;;  %v2928_v63 = vld [vmem:[#allocation2 + $0x1ac] ss:$16 sps:$4 sm:$0xff]   ;;  %v2930_v1 = vld [vmem:[#allocation2 + $0x1a0] ss:$16 sps:$4 sm:$0xff]  }
  0x4a   :  { %1085 = vmatpush1.bf16.msra.mxu1 %v2877_v22  ;;  %1004 = vmatprep.subr.bf16.mxu0 %v2878_v23  ;;  %v2931_v2 = vld [vmem:[#allocation2 + $0x1a8] ss:$16 sps:$4 sm:$0xff]   ;;  %v2932_v3 = vld [vmem:[#allocation2 + $0x1c4] ss:$16 sps:$4 sm:$0xff]   ;;  %v2934_v4 = vld [vmem:[#allocation2 + $0x1cc] ss:$16 sps:$4 sm:$0xff]   ;;  %v113_v22 = vrot.slane %v3450_v46, %v3456_v13 }
  0x4b   :  { %1086 = vmatprep.subr.bf16.mxu1 %v2880_v24  ;;  %v2936_v5 = vld [vmem:[#allocation2 + $0x1c0] ss:$16 sps:$4 sm:$0xff]   ;;  %v2937_v6 = vld [vmem:[#allocation2 + $0x1c8] ss:$16 sps:$4 sm:$0xff]   ;;  %v2938_v7 = vld [vmem:[#allocation2 + $0x1e4] ss:$16 sps:$4 sm:$0xff]  }
  0x4c   :  { %v2940_v8 = vld [vmem:[#allocation2 + $0x1ec] ss:$16 sps:$4 sm:$0xff]   ;;  %v2942_v9 = vld [vmem:[#allocation2 + $0x1e0] ss:$16 sps:$4 sm:$0xff]   ;;  %v2943_v10 = vld [vmem:[#allocation2 + $0x1e8] ss:$16 sps:$4 sm:$0xff]  }
  0x4d   :  { %1005 = vmatpush1.bf16.msra.mxu0 %v2882_v25  ;;  %v2946_v11 = vld [vmem:[#allocation2 + $0x204] ss:$16 sps:$4 sm:$0xff]   ;;  %v2949_v12 = vld [vmem:[#allocation2 + $0x20c] ss:$16 sps:$4 sm:$0xff]   ;;  %v3459_v14 = vsub.s32 2, %v3440_v34  ;;  %v96_v15 = vsub.s32 6, %v3440_v34 }
  0x4e   :  { %1087 = vmatpush1.bf16.msra.mxu1 %v2883_v26  ;;  %1006 = vmatprep.subr.bf16.mxu0 %v2884_v27  ;;  %v3463_v16 = vsub.s32 1, %v3440_v34  ;;  %v3466_v17 = vsub.s32 3, %v3440_v34  ;;  %v140_v18 = vsub.s32 7, %v3440_v34  ;;  %v170_v26 = vld [vmem:[%s3543_s2] sm:$0xf]  ;;  %vm2472_vm0 = vcmask 15360  }
  0x4f   :  { %1088 = vmatprep.subr.bf16.mxu1 %v2886_v28  ;;  %v89_v20 = vrot.slane %v3447_v45, %v3459_v14  ;;  %v97_v21 = vrot.slane %v3447_v45, %v96_v15  ;;  %v105_v28 = vrot.slane %v85_v19, %v3456_v13  ;;  %v2970_v15 = vld [vmem:[#allocation2 + $0x284] ss:$16 sps:$4 sm:$0xff]   ;;  %v2968_v19 = vld [vmem:[#allocation2 + $0x280] ss:$16 sps:$4 sm:$0xff]  }
  0x50   :  { %v129_v23 = vrot.slane %v3447_v45, %v3463_v16  ;;  %v133_v24 = vrot.slane %v3447_v45, %v3466_v17  ;;  %v141_v25 = vrot.slane %v3447_v45, %v140_v18  ;;  %v157_v34 = vrot.slane %v3453_v48, %v3463_v16  ;;  %v2973_v18 = vld [vmem:[#allocation2 + $0x28c] ss:$16 sps:$4 sm:$0xff]  }
  0x51   :  { %1007 = vmatpush1.bf16.msra.mxu0 %v2888_v29  ;;  %v109_v29 = vrot.slane %v89_v20, %v3456_v13  ;;  %v117_v30 = vrot.slane %v97_v21, %v3456_v13  ;;  %v2971_v20 = vld [vmem:[#allocation2 + $0x288] ss:$16 sps:$4 sm:$0xff]   ;;  %v2976_v21 = vld [vmem:[#allocation2 + $0x2a4] ss:$16 sps:$4 sm:$0xff]  }
  0x52   :  { %1089 = vmatpush1.bf16.msra.mxu1 %v2889_v31  ;;  %1008 = vmatprep.subr.bf16.mxu0 %v2890_v32  ;;  %v149_v32 = vrot.slane %v129_v23, %v3463_v16  ;;  %v2974_v23 = vld [vmem:[#allocation2 + $0x2a0] ss:$16 sps:$4 sm:$0xff]  }
  0x53   :  { %1090 = vmatprep.subr.bf16.mxu1 %v2892_v33  ;;  %v153_v33 = vrot.slane %v133_v24, %v3463_v16  ;;  %v2977_v24 = vld [vmem:[#allocation2 + $0x2a8] ss:$16 sps:$4 sm:$0xff]  }
  0x55   :  { %1009 = vmatpush1.bf16.msra.mxu0 %v2894_v35  ;;  %v161_v35 = vrot.slane %v141_v25, %v3463_v16  ;;  %v2982_v25 = vld [vmem:[#allocation2 + $0x2c4] ss:$16 sps:$4 sm:$0xff]  }
  0x56   :  { %1091 = vmatpush1.bf16.msra.mxu1 %v2895_v36  ;;  %1010 = vmatprep.subr.bf16.mxu0 %v2896_v37  ;;  %v183_v36 = vrot.slane %v170_v26, %v3459_v14  ;;  %v179_v37 = vrot.slane %v170_v26, %v3463_v16 }
  0x57   :  { %1092 = vmatprep.subr.bf16.mxu1 %v2898_v38  ;;  %v175_v38 = vrot.slane %v170_v26, %v3456_v13 }
  0x59   :  { %1011 = vmatpush1.bf16.msra.mxu0 %v2900_v39 }
  0x5a   :  { %1093 = vmatpush1.bf16.msra.mxu1 %v2901_v41  ;;  %1012 = vmatprep.subr.bf16.mxu0 %v2902_v43  ;;  %v187_v43 = vrot.slane %v170_v26, %v3466_v17  ;;  %v2985_v26 = vld [vmem:[#allocation2 + $0x2cc] ss:$16 sps:$4 sm:$0xff]  }
  0x5b   :  { %1094 = vmatprep.subr.bf16.mxu1 %v2904_v44 }
  0x5d   :  { %1013 = vmatpush1.bf16.msra.mxu0 %v2906_v47 }
  0x5e   :  { %1095 = vmatpush1.bf16.msra.mxu1 %v2907_v49  ;;  %1014 = vmatprep.subr.bf16.mxu0 %v2908_v50 }
  0x5f   :  { %1096 = vmatprep.subr.bf16.mxu1 %v2910_v51 }
  0x61   :  { %1015 = vmatpush1.bf16.msra.mxu0 %v2912_v52 }
  0x62   :  { %1097 = vmatpush1.bf16.msra.mxu1 %v2913_v53  ;;  %1016 = vmatprep.subr.bf16.mxu0 %v2914_v54 }
  0x63   :  { %1098 = vmatprep.subr.bf16.mxu1 %v2916_v55 }
  0x65   :  { %1017 = vmatpush1.bf16.msra.mxu0 %v2918_v56 }
  0x66   :  { %1099 = vmatpush1.bf16.msra.mxu1 %v2919_v57  ;;  %1018 = vmatprep.subr.bf16.mxu0 %v2920_v58  ;;  %v2944_v57 = vld [vmem:[#allocation2 + $0x200] ss:$16 sps:$4 sm:$0xff]   ;;  %v2947_v58 = vld [vmem:[#allocation2 + $0x208] ss:$16 sps:$4 sm:$0xff]  }
  0x67   :  { %1100 = vmatprep.subr.bf16.mxu1 %v2922_v59 }
  0x69   :  { %1019 = vmatpush1.bf16.msra.mxu0 %v2924_v60 }
  0x6a   :  { %1101 = vmatpush1.bf16.msra.mxu1 %v2925_v61  ;;  %1020 = vmatprep.subr.bf16.mxu0 %v2926_v62 }
  0x6b   :  { %1102 = vmatprep.subr.bf16.mxu1 %v2928_v63  ;;  %v2952_v63 = vld [vmem:[#allocation2 + $0x224] ss:$16 sps:$4 sm:$0xff]  }
  0x6d   :  { %1021 = vmatpush1.bf16.msra.mxu0 %v2930_v1  ;;  %v2955_v1 = vld [vmem:[#allocation2 + $0x22c] ss:$16 sps:$4 sm:$0xff]  }
  0x6e   :  { %1103 = vmatpush1.bf16.msra.mxu1 %v2931_v2  ;;  %1022 = vmatprep.subr.bf16.mxu0 %v2932_v3  ;;  %v2950_v2 = vld [vmem:[#allocation2 + $0x220] ss:$16 sps:$4 sm:$0xff]   ;;  %v2953_v3 = vld [vmem:[#allocation2 + $0x228] ss:$16 sps:$4 sm:$0xff]  }
  0x6f   :  { %1104 = vmatprep.subr.bf16.mxu1 %v2934_v4 }
  0x71   :  { %1023 = vmatpush1.bf16.msra.mxu0 %v2936_v5  ;;  %v2958_v5 = vld [vmem:[#allocation2 + $0x244] ss:$16 sps:$4 sm:$0xff]  }
  0x72   :  { %1105 = vmatpush1.bf16.msra.mxu1 %v2937_v6  ;;  %1024 = vmatprep.subr.bf16.mxu0 %v2938_v7  ;;  %v2961_v6 = vld [vmem:[#allocation2 + $0x24c] ss:$16 sps:$4 sm:$0xff]   ;;  %v2956_v7 = vld [vmem:[#allocation2 + $0x240] ss:$16 sps:$4 sm:$0xff]  }
  0x73   :  { %1106 = vmatprep.subr.bf16.mxu1 %v2940_v8  ;;  %v2959_v8 = vld [vmem:[#allocation2 + $0x248] ss:$16 sps:$4 sm:$0xff]  }
  0x75   :  { %1025 = vmatpush1.bf16.msra.mxu0 %v2942_v9  ;;  %v2964_v9 = vld [vmem:[#allocation2 + $0x264] ss:$16 sps:$4 sm:$0xff]  }
  0x76   :  { %1107 = vmatpush1.bf16.msra.mxu1 %v2943_v10  ;;  %1035 = vmatprep.subr.bf16.mxu0 %v2946_v11  ;;  %v2967_v10 = vld [vmem:[#allocation2 + $0x26c] ss:$16 sps:$4 sm:$0xff]   ;;  %v2962_v11 = vld [vmem:[#allocation2 + $0x260] ss:$16 sps:$4 sm:$0xff]  }
  0x77   :  { %1117 = vmatprep.subr.bf16.mxu1 %v2949_v12  ;;  %v2965_v12 = vld [vmem:[#allocation2 + $0x268] ss:$16 sps:$4 sm:$0xff]  }
  0xb7   :  { %v79_v27 = vpop.permute.xlu0 %78 }
  0xb8   :  { %v120_v31 = vmul.f32 %v113_v22, %v79_v27  ;;  %v118_v39 = vmul.f32 %v105_v28, %v79_v27  ;;  %v119_v40 = vmul.f32 %v109_v29, %v79_v27  ;;  %v121_v41 = vmul.f32 %v117_v30, %v79_v27  ;;  %v2979_v22 = vld [vmem:[#allocation2 + $0x2ac] ss:$16 sps:$4 sm:$0xff]   ;;  %v2980_v27 = vld [vmem:[#allocation2 + $0x2c0] ss:$16 sps:$4 sm:$0xff]   ;;  %v2983_v28 = vld [vmem:[#allocation2 + $0x2c8] ss:$16 sps:$4 sm:$0xff]  }
  0xb9   :  { %v2988_v29 = vld [vmem:[#allocation2 + $0x2e4] ss:$16 sps:$4 sm:$0xff]   ;;  %v2991_v30 = vld [vmem:[#allocation2 + $0x2ec] ss:$16 sps:$4 sm:$0xff]  }
  0xbc   :  { %v124_v42 = vpop.permute.xlu0 %123 }
  0xbd   :  { %v162_v44 = vmul.f32 %v149_v32, %v124_v42  ;;  %v163_v45 = vmul.f32 %v153_v33, %v124_v42  ;;  %v164_v46 = vmul.f32 %v157_v34, %v124_v42  ;;  %v165_v47 = vmul.f32 %v161_v35, %v124_v42  ;;  %v2989_v32 = vld [vmem:[#allocation2 + $0x2e8] ss:$16 sps:$4 sm:$0xff]   ;;  %v2994_v33 = vld [vmem:[#allocation2 + $0x304] ss:$16 sps:$4 sm:$0xff]   ;;  %v2997_v34 = vld [vmem:[#allocation2 + $0x30c] ss:$16 sps:$4 sm:$0xff]  }
  0xbe   :  { %v2992_v35 = vld [vmem:[#allocation2 + $0x300] ss:$16 sps:$4 sm:$0xff]   ;;  %v3009_v42 = vld [vmem:[#allocation2 + $0x34c] ss:$16 sps:$4 sm:$0xff]  }
  0xbf   :  { %v166_v49 = vadd.f32 %v162_v44, %v118_v39  ;;  %v167_v48 = vadd.f32 %v163_v45, %v119_v40  ;;  %v168_v50 = vadd.f32 %v164_v46, %v120_v31  ;;  %v169_v51 = vadd.f32 %v165_v47, %v121_v41  ;;  %v2986_v31 = vld [vmem:[#allocation2 + $0x2e0] ss:$16 sps:$4 sm:$0xff]   ;;  %v3001_v40 = vld [vmem:[#allocation2 + $0x328] ss:$16 sps:$4 sm:$0xff]   ;;  %v3006_v41 = vld [vmem:[#allocation2 + $0x344] ss:$16 sps:$4 sm:$0xff]  }
  0xc0   :  { %v2998_v39 = vld [vmem:[#allocation2 + $0x320] ss:$16 sps:$4 sm:$0xff]   ;;  %v3007_v44 = vld [vmem:[#allocation2 + $0x348] ss:$16 sps:$4 sm:$0xff]   ;;  %v3012_v45 = vld [vmem:[#allocation2 + $0x364] ss:$16 sps:$4 sm:$0xff]  }
  0xc1   :  { %v3496_v52 = vadd.f32 %v183_v36, %v168_v50  ;;  %v193_v53 = vadd.f32 %v179_v37, %v167_v48  ;;  %v192_v54 = vadd.f32 %v175_v38, %v166_v49  ;;  %v195_v55 = vadd.f32 %v187_v43, %v169_v51  ;;  %v2995_v36 = vld [vmem:[#allocation2 + $0x308] ss:$16 sps:$4 sm:$0xff]   ;;  %v3000_v37 = vld [vmem:[#allocation2 + $0x324] ss:$16 sps:$4 sm:$0xff]   ;;  %v3003_v38 = vld [vmem:[#allocation2 + $0x32c] ss:$16 sps:$4 sm:$0xff]  }
  0xc2   :  { %v3004_v43 = vld [vmem:[#allocation2 + $0x340] ss:$16 sps:$4 sm:$0xff]   ;;  %v3015_v46 = vld [vmem:[#allocation2 + $0x36c] ss:$16 sps:$4 sm:$0xff]   ;;  %v3013_v49 = vld [vmem:[#allocation2 + $0x368] ss:$16 sps:$4 sm:$0xff]  }
  0xc3   :  { %v197_v56 = vpack.c.bf16 %v193_v53, %v193_v53  ;;  %v196_v59 = vpack.c.bf16 %v192_v54, %v192_v54  ;;  %v199_v60 = vpack.c.bf16 %v195_v55, %v195_v55  ;;  %v3010_v47 = vld [vmem:[#allocation2 + $0x360] ss:$16 sps:$4 sm:$0xff]   ;;  %v3018_v48 = vld [vmem:[#allocation2 + $0x384] ss:$16 sps:$4 sm:$0xff]   ;;  %v3021_v50 = vld [vmem:[#allocation2 + $0x38c] ss:$16 sps:$4 sm:$0xff]  }
  0xc4   :  { %v3016_v51 = vld [vmem:[#allocation2 + $0x380] ss:$16 sps:$4 sm:$0xff]   ;;  %v3019_v53 = vld [vmem:[#allocation2 + $0x388] ss:$16 sps:$4 sm:$0xff]   ;;  %v3024_v54 = vld [vmem:[#allocation2 + $0x3a4] ss:$16 sps:$4 sm:$0xff]  }
  0xc5   :  { %v201_v61 = vmax.bf16 %v3341_v0, %v197_v56  ;;  %v200_v62 = vmax.bf16 %v3341_v0, %v196_v59  ;;  %v203_v4 = vmax.bf16 %v3341_v0, %v199_v60  ;;  %v3027_v55 = vld [vmem:[#allocation2 + $0x3ac] ss:$16 sps:$4 sm:$0xff]   ;;  %v3022_v56 = vld [vmem:[#allocation2 + $0x3a0] ss:$16 sps:$4 sm:$0xff]  }
  0xc6   :  { %v3033_v59 = vld [vmem:[#allocation2 + $0x3cc] ss:$16 sps:$4 sm:$0xff]   ;;  %v3028_v60 = vld [vmem:[#allocation2 + $0x3c0] ss:$16 sps:$4 sm:$0xff]  }
  0xc7   :  { %1026 = vmatprep.mubr.bf16.mxu0 %v201_v61  ;;  %1108 = vmatprep.mubr.bf16.mxu1 %v201_v61  ;;  %v3031_v61 = vld [vmem:[#allocation2 + $0x3c8] ss:$16 sps:$4 sm:$0xff]  }
  0xc8   :  { %1027 = vmatmul.mubr.bf16.vlgmr.msra.gmra.mrb[0].mxu0 %v200_v62  ;;  %1109 = vmatmul.mubr.bf16.vlgmr.msra.gmra.mrb[0].mxu1 %v200_v62  ;;  %v3036_v62 = vld [vmem:[#allocation2 + $0x3e4] ss:$16 sps:$4 sm:$0xff]  }
  0xc9   :  { %1036 = vmatpush1.bf16.msra.mxu0 %v2944_v57  ;;  %1118 = vmatpush1.bf16.msra.mxu1 %v2947_v58  ;;  %v3025_v57 = vld [vmem:[#allocation2 + $0x3a8] ss:$16 sps:$4 sm:$0xff]   ;;  %v3030_v58 = vld [vmem:[#allocation2 + $0x3c4] ss:$16 sps:$4 sm:$0xff]  }
  0xca   :  { %1067 = vmatprep.mubr.bf16.mxu0 %v203_v4  ;;  %1149 = vmatprep.mubr.bf16.mxu1 %v203_v4  ;;  %v3042_v4 = vld [vmem:[#allocation4 + $0x4] ss:$16 sps:$4 sm:$0xff]  }
  0xcb   :  { %1037 = vmatprep.subr.bf16.mxu0 %v2952_v63  ;;  %1119 = vmatprep.subr.bf16.mxu1 %v2955_v1  ;;  %v3039_v63 = vld [vmem:[#allocation2 + $0x3ec] ss:$16 sps:$4 sm:$0xff]   ;;  %v3034_v1 = vld [vmem:[#allocation2 + $0x3e0] ss:$16 sps:$4 sm:$0xff]  }
  0xcd   :  { %1038 = vmatpush1.bf16.msra.mxu0 %v2950_v2  ;;  %1120 = vmatpush1.bf16.msra.mxu1 %v2953_v3  ;;  %v3037_v2 = vld [vmem:[#allocation2 + $0x3e8] ss:$16 sps:$4 sm:$0xff]   ;;  %v198_v3 = vpack.c.bf16 %v3496_v52, %v3496_v52 }
  0xce   :  { %1039 = vmatprep.subr.bf16.mxu0 %v2958_v5  ;;  %1121 = vmatprep.subr.bf16.mxu1 %v2961_v6  ;;  %v3045_v5 = vld [vmem:[#allocation4 + $0xc] ss:$16 sps:$4 sm:$0xff]   ;;  %v3040_v6 = vld [vmem:[#allocation4] ss:$16 sps:$4 sm:$0xff]   ;;  %v3049_v52 = vld [vmem:[#allocation4 + $0x28] ss:$16 sps:$4 sm:$0xff]  }
  0xd1   :  { %1040 = vmatpush1.bf16.msra.mxu0 %v2956_v7  ;;  %1122 = vmatpush1.bf16.msra.mxu1 %v2959_v8  ;;  %v3043_v7 = vld [vmem:[#allocation4 + $0x8] ss:$16 sps:$4 sm:$0xff]   ;;  %v202_v8 = vmax.bf16 %v3341_v0, %v198_v3  ;;  %v3129_v3 = vld [vmem:[#allocation4 + $0x1cc] ss:$16 sps:$4 sm:$0xff]  }
  0xd2   :  { %1041 = vmatprep.subr.bf16.mxu0 %v2964_v9  ;;  %1123 = vmatprep.subr.bf16.mxu1 %v2967_v10  ;;  %v3048_v9 = vld [vmem:[#allocation4 + $0x24] ss:$16 sps:$4 sm:$0xff]   ;;  %v3051_v10 = vld [vmem:[#allocation4 + $0x2c] ss:$16 sps:$4 sm:$0xff]  }
  0xd5   :  { %1042 = vmatpush1.bf16.msra.mxu0 %v2962_v11  ;;  %1124 = vmatpush1.bf16.msra.mxu1 %v2965_v12  ;;  %v3046_v11 = vld [vmem:[#allocation4 + $0x20] ss:$16 sps:$4 sm:$0xff]   ;;  %v3054_v12 = vld [vmem:[#allocation4 + $0x44] ss:$16 sps:$4 sm:$0xff]  }
  0xd6   :  { %1043 = vmatprep.subr.bf16.mxu0 %v2970_v15  ;;  %1125 = vmatprep.subr.bf16.mxu1 %v2973_v18  ;;  %v3057_v15 = vld [vmem:[#allocation4 + $0x4c] ss:$16 sps:$4 sm:$0xff]   ;;  %v3052_v18 = vld [vmem:[#allocation4 + $0x40] ss:$16 sps:$4 sm:$0xff]  }
  0xd9   :  { %1044 = vmatpush1.bf16.msra.mxu0 %v2968_v19  ;;  %1126 = vmatpush1.bf16.msra.mxu1 %v2971_v20  ;;  %v3055_v19 = vld [vmem:[#allocation4 + $0x48] ss:$16 sps:$4 sm:$0xff]   ;;  %v3060_v20 = vld [vmem:[#allocation4 + $0x64] ss:$16 sps:$4 sm:$0xff]  }
  0xda   :  { %1045 = vmatprep.subr.bf16.mxu0 %v2976_v21  ;;  %1127 = vmatprep.subr.bf16.mxu1 %v2979_v22  ;;  %v3063_v21 = vld [vmem:[#allocation4 + $0x6c] ss:$16 sps:$4 sm:$0xff]   ;;  %v3058_v22 = vld [vmem:[#allocation4 + $0x60] ss:$16 sps:$4 sm:$0xff]  }
  0xdd   :  { %1046 = vmatpush1.bf16.msra.mxu0 %v2974_v23  ;;  %1128 = vmatpush1.bf16.msra.mxu1 %v2977_v24  ;;  %v3061_v23 = vld [vmem:[#allocation4 + $0x68] ss:$16 sps:$4 sm:$0xff]   ;;  %v3066_v24 = vld [vmem:[#allocation4 + $0x84] ss:$16 sps:$4 sm:$0xff]  }
  0xde   :  { %1047 = vmatprep.subr.bf16.mxu0 %v2982_v25  ;;  %1129 = vmatprep.subr.bf16.mxu1 %v2985_v26  ;;  %v3069_v25 = vld [vmem:[#allocation4 + $0x8c] ss:$16 sps:$4 sm:$0xff]   ;;  %v3064_v26 = vld [vmem:[#allocation4 + $0x80] ss:$16 sps:$4 sm:$0xff]  }
  0xe1   :  { %1048 = vmatpush1.bf16.msra.mxu0 %v2980_v27  ;;  %1130 = vmatpush1.bf16.msra.mxu1 %v2983_v28  ;;  %v3067_v27 = vld [vmem:[#allocation4 + $0x88] ss:$16 sps:$4 sm:$0xff]   ;;  %v3072_v28 = vld [vmem:[#allocation4 + $0xa4] ss:$16 sps:$4 sm:$0xff]  }
  0xe2   :  { %1049 = vmatprep.subr.bf16.mxu0 %v2988_v29  ;;  %1131 = vmatprep.subr.bf16.mxu1 %v2991_v30  ;;  %v3075_v29 = vld [vmem:[#allocation4 + $0xac] ss:$16 sps:$4 sm:$0xff]   ;;  %v3070_v30 = vld [vmem:[#allocation4 + $0xa0] ss:$16 sps:$4 sm:$0xff]  }
  0xe5   :  { %1050 = vmatpush1.bf16.msra.mxu0 %v2986_v31  ;;  %1132 = vmatpush1.bf16.msra.mxu1 %v2989_v32  ;;  %v3073_v31 = vld [vmem:[#allocation4 + $0xa8] ss:$16 sps:$4 sm:$0xff]   ;;  %v3078_v32 = vld [vmem:[#allocation4 + $0xc4] ss:$16 sps:$4 sm:$0xff]  }
  0xe6   :  { %1051 = vmatprep.subr.bf16.mxu0 %v2994_v33  ;;  %1133 = vmatprep.subr.bf16.mxu1 %v2997_v34  ;;  %v3081_v33 = vld [vmem:[#allocation4 + $0xcc] ss:$16 sps:$4 sm:$0xff]   ;;  %v3076_v34 = vld [vmem:[#allocation4 + $0xc0] ss:$16 sps:$4 sm:$0xff]  }
  0xe9   :  { %1052 = vmatpush1.bf16.msra.mxu0 %v2992_v35  ;;  %1134 = vmatpush1.bf16.msra.mxu1 %v2995_v36  ;;  %v3079_v35 = vld [vmem:[#allocation4 + $0xc8] ss:$16 sps:$4 sm:$0xff]   ;;  %v3084_v36 = vld [vmem:[#allocation4 + $0xe4] ss:$16 sps:$4 sm:$0xff]  }
  0xea   :  { %1053 = vmatprep.subr.bf16.mxu0 %v3000_v37  ;;  %1135 = vmatprep.subr.bf16.mxu1 %v3003_v38  ;;  %v3087_v37 = vld [vmem:[#allocation4 + $0xec] ss:$16 sps:$4 sm:$0xff]   ;;  %v3082_v38 = vld [vmem:[#allocation4 + $0xe0] ss:$16 sps:$4 sm:$0xff]  }
  0xed   :  { %1054 = vmatpush1.bf16.msra.mxu0 %v2998_v39  ;;  %1136 = vmatpush1.bf16.msra.mxu1 %v3001_v40  ;;  %v3085_v39 = vld [vmem:[#allocation4 + $0xe8] ss:$16 sps:$4 sm:$0xff]   ;;  %v3090_v40 = vld [vmem:[#allocation4 + $0x104] ss:$16 sps:$4 sm:$0xff]  }
  0xee   :  { %1055 = vmatprep.subr.bf16.mxu0 %v3006_v41  ;;  %1137 = vmatprep.subr.bf16.mxu1 %v3009_v42  ;;  %v3093_v41 = vld [vmem:[#allocation4 + $0x10c] ss:$16 sps:$4 sm:$0xff]   ;;  %v3088_v42 = vld [vmem:[#allocation4 + $0x100] ss:$16 sps:$4 sm:$0xff]  }
  0xf1   :  { %1056 = vmatpush1.bf16.msra.mxu0 %v3004_v43  ;;  %1138 = vmatpush1.bf16.msra.mxu1 %v3007_v44  ;;  %v3091_v43 = vld [vmem:[#allocation4 + $0x108] ss:$16 sps:$4 sm:$0xff]   ;;  %v3096_v44 = vld [vmem:[#allocation4 + $0x124] ss:$16 sps:$4 sm:$0xff]  }
  0xf2   :  { %1057 = vmatprep.subr.bf16.mxu0 %v3012_v45  ;;  %1139 = vmatprep.subr.bf16.mxu1 %v3015_v46  ;;  %v3099_v45 = vld [vmem:[#allocation4 + $0x12c] ss:$16 sps:$4 sm:$0xff]   ;;  %v3094_v46 = vld [vmem:[#allocation4 + $0x120] ss:$16 sps:$4 sm:$0xff]  }
  0xf5   :  { %1058 = vmatpush1.bf16.msra.mxu0 %v3010_v47  ;;  %1140 = vmatpush1.bf16.msra.mxu1 %v3013_v49  ;;  %v3097_v47 = vld [vmem:[#allocation4 + $0x128] ss:$16 sps:$4 sm:$0xff]   ;;  %v3102_v49 = vld [vmem:[#allocation4 + $0x144] ss:$16 sps:$4 sm:$0xff]  }
  0xf6   :  { %1059 = vmatprep.subr.bf16.mxu0 %v3018_v48  ;;  %1141 = vmatprep.subr.bf16.mxu1 %v3021_v50  ;;  %v3105_v48 = vld [vmem:[#allocation4 + $0x14c] ss:$16 sps:$4 sm:$0xff]   ;;  %v3100_v50 = vld [vmem:[#allocation4 + $0x140] ss:$16 sps:$4 sm:$0xff]  }
  0xf9   :  { %1060 = vmatpush1.bf16.msra.mxu0 %v3016_v51  ;;  %1142 = vmatpush1.bf16.msra.mxu1 %v3019_v53  ;;  %v3103_v51 = vld [vmem:[#allocation4 + $0x148] ss:$16 sps:$4 sm:$0xff]   ;;  %v3108_v53 = vld [vmem:[#allocation4 + $0x164] ss:$16 sps:$4 sm:$0xff]  }
  0xfa   :  { %1061 = vmatprep.subr.bf16.mxu0 %v3024_v54  ;;  %1143 = vmatprep.subr.bf16.mxu1 %v3027_v55  ;;  %v3111_v54 = vld [vmem:[#allocation4 + $0x16c] ss:$16 sps:$4 sm:$0xff]   ;;  %v3106_v55 = vld [vmem:[#allocation4 + $0x160] ss:$16 sps:$4 sm:$0xff]  }
  0xfd   :  { %1062 = vmatpush1.bf16.msra.mxu0 %v3022_v56  ;;  %1144 = vmatpush1.bf16.msra.mxu1 %v3025_v57  ;;  %v3109_v56 = vld [vmem:[#allocation4 + $0x168] ss:$16 sps:$4 sm:$0xff]   ;;  %v3114_v57 = vld [vmem:[#allocation4 + $0x184] ss:$16 sps:$4 sm:$0xff]  }
  0xfe   :  { %1063 = vmatprep.subr.bf16.mxu0 %v3030_v58  ;;  %1145 = vmatprep.subr.bf16.mxu1 %v3033_v59  ;;  %v3117_v58 = vld [vmem:[#allocation4 + $0x18c] ss:$16 sps:$4 sm:$0xff]   ;;  %v3112_v59 = vld [vmem:[#allocation4 + $0x180] ss:$16 sps:$4 sm:$0xff]  }
 0x101   :  { %1064 = vmatpush1.bf16.msra.mxu0 %v3028_v60  ;;  %1146 = vmatpush1.bf16.msra.mxu1 %v3031_v61  ;;  %v3115_v60 = vld [vmem:[#allocation4 + $0x188] ss:$16 sps:$4 sm:$0xff]   ;;  %v3120_v61 = vld [vmem:[#allocation4 + $0x1a4] ss:$16 sps:$4 sm:$0xff]  }
 0x102   :  { %1065 = vmatprep.subr.bf16.mxu0 %v3036_v62  ;;  %1147 = vmatprep.subr.bf16.mxu1 %v3039_v63  ;;  %v3123_v62 = vld [vmem:[#allocation4 + $0x1ac] ss:$16 sps:$4 sm:$0xff]   ;;  %v3118_v63 = vld [vmem:[#allocation4 + $0x1a0] ss:$16 sps:$4 sm:$0xff]  }
 0x105   :  { %1066 = vmatpush1.bf16.msra.mxu0 %v3034_v1  ;;  %1148 = vmatpush1.bf16.msra.mxu1 %v3037_v2  ;;  %v3121_v1 = vld [vmem:[#allocation4 + $0x1a8] ss:$16 sps:$4 sm:$0xff]   ;;  %v3126_v2 = vld [vmem:[#allocation4 + $0x1c4] ss:$16 sps:$4 sm:$0xff]  }
 0x106   :  { %1956 = vmatprep.subr.bf16.mxu0 %v3042_v4  ;;  %2038 = vmatprep.subr.bf16.mxu1 %v3045_v5  ;;  %v3124_v4 = vld [vmem:[#allocation4 + $0x1c0] ss:$16 sps:$4 sm:$0xff]   ;;  %v3127_v5 = vld [vmem:[#allocation4 + $0x1c8] ss:$16 sps:$4 sm:$0xff]  }
 0x108   :  { %1068 = vmatmul.mubr.bf16.vlgmr.msra.gmra.mrb[0].mxu0 %v202_v8  ;;  %1150 = vmatmul.mubr.bf16.vlgmr.msra.gmra.mrb[0].mxu1 %v202_v8  ;;  %v3130_v8 = vld [vmem:[#allocation4 + $0x1e0] ss:$16 sps:$4 sm:$0xff]  }
 0x109   :  { %1957 = vmatpush1.bf16.msra.mxu0 %v3040_v6  ;;  %2039 = vmatpush1.bf16.msra.mxu1 %v3043_v7  ;;  %v3132_v6 = vld [vmem:[#allocation4 + $0x1e4] ss:$16 sps:$4 sm:$0xff]   ;;  %v3135_v7 = vld [vmem:[#allocation4 + $0x1ec] ss:$16 sps:$4 sm:$0xff]  }
 0x10a   :  { %1958 = vmatprep.subr.bf16.mxu0 %v3048_v9  ;;  %2040 = vmatprep.subr.bf16.mxu1 %v3051_v10  ;;  %v3133_v9 = vld [vmem:[#allocation4 + $0x1e8] ss:$16 sps:$4 sm:$0xff]   ;;  %v3138_v10 = vld [vmem:[#allocation4 + $0x204] ss:$16 sps:$4 sm:$0xff]  }
 0x10d   :  { %1959 = vmatpush1.bf16.msra.mxu0 %v3046_v11  ;;  %2041 = vmatpush1.bf16.msra.mxu1 %v3049_v52  ;;  %v3141_v11 = vld [vmem:[#allocation4 + $0x20c] ss:$16 sps:$4 sm:$0xff]   ;;  %v3507_v52 = vld [vmem:[%s3545_s4] sm:$0xf] }
 0x10e   :  { %1960 = vmatprep.subr.bf16.mxu0 %v3054_v12  ;;  %2042 = vmatprep.subr.bf16.mxu1 %v3057_v15  ;;  %v337_v12 = vrot.slane %v3507_v52, %v3456_v13  ;;  %v341_v15 = vrot.slane %v3507_v52, %v3463_v16 }
 0x111   :  { %1961 = vmatpush1.bf16.msra.mxu0 %v3052_v18  ;;  %2043 = vmatpush1.bf16.msra.mxu1 %v3055_v19  ;;  %v349_v18 = vrot.slane %v3507_v52, %v3466_v17 }
 0x112   :  { %1962 = vmatprep.subr.bf16.mxu0 %v3060_v20  ;;  %2044 = vmatprep.subr.bf16.mxu1 %v3063_v21 }
 0x115   :  { %1963 = vmatpush1.bf16.msra.mxu0 %v3058_v22  ;;  %2045 = vmatpush1.bf16.msra.mxu1 %v3061_v23 }
 0x116   :  { %1964 = vmatprep.subr.bf16.mxu0 %v3066_v24  ;;  %2046 = vmatprep.subr.bf16.mxu1 %v3069_v25 }
 0x119   :  { %1965 = vmatpush1.bf16.msra.mxu0 %v3064_v26  ;;  %2047 = vmatpush1.bf16.msra.mxu1 %v3067_v27 }
 0x11a   :  { %1966 = vmatprep.subr.bf16.mxu0 %v3072_v28  ;;  %2048 = vmatprep.subr.bf16.mxu1 %v3075_v29 }
 0x11d   :  { %1967 = vmatpush1.bf16.msra.mxu0 %v3070_v30  ;;  %2049 = vmatpush1.bf16.msra.mxu1 %v3073_v31 }
 0x11e   :  { %1968 = vmatprep.subr.bf16.mxu0 %v3078_v32  ;;  %2050 = vmatprep.subr.bf16.mxu1 %v3081_v33 }
 0x121   :  { %1969 = vmatpush1.bf16.msra.mxu0 %v3076_v34  ;;  %2051 = vmatpush1.bf16.msra.mxu1 %v3079_v35  ;;  %v3136_v34 = vld [vmem:[#allocation4 + $0x200] ss:$16 sps:$4 sm:$0xff]   ;;  %v3139_v35 = vld [vmem:[#allocation4 + $0x208] ss:$16 sps:$4 sm:$0xff]  }
 0x122   :  { %1970 = vmatprep.subr.bf16.mxu0 %v3084_v36  ;;  %2052 = vmatprep.subr.bf16.mxu1 %v3087_v37  ;;  %v3144_v37 = vld [vmem:[#allocation4 + $0x224] ss:$16 sps:$4 sm:$0xff]  }
 0x125   :  { %1971 = vmatpush1.bf16.msra.mxu0 %v3082_v38  ;;  %2053 = vmatpush1.bf16.msra.mxu1 %v3085_v39  ;;  %v3147_v38 = vld [vmem:[#allocation4 + $0x22c] ss:$16 sps:$4 sm:$0xff]  }
 0x126   :  { %1972 = vmatprep.subr.bf16.mxu0 %v3090_v40  ;;  %2054 = vmatprep.subr.bf16.mxu1 %v3093_v41  ;;  %v3142_v40 = vld [vmem:[#allocation4 + $0x220] ss:$16 sps:$4 sm:$0xff]   ;;  %v3145_v41 = vld [vmem:[#allocation4 + $0x228] ss:$16 sps:$4 sm:$0xff]  }
 0x129   :  { %1973 = vmatpush1.bf16.msra.mxu0 %v3088_v42  ;;  %2055 = vmatpush1.bf16.msra.mxu1 %v3091_v43  ;;  %v3150_v42 = vld [vmem:[#allocation4 + $0x244] ss:$16 sps:$4 sm:$0xff]   ;;  %v3153_v43 = vld [vmem:[#allocation4 + $0x24c] ss:$16 sps:$4 sm:$0xff]  }
 0x12a   :  { %1974 = vmatprep.subr.bf16.mxu0 %v3096_v44  ;;  %2056 = vmatprep.subr.bf16.mxu1 %v3099_v45  ;;  %v3148_v44 = vld [vmem:[#allocation4 + $0x240] ss:$16 sps:$4 sm:$0xff]   ;;  %v3151_v45 = vld [vmem:[#allocation4 + $0x248] ss:$16 sps:$4 sm:$0xff]  }
 0x12d   :  { %1975 = vmatpush1.bf16.msra.mxu0 %v3094_v46  ;;  %2057 = vmatpush1.bf16.msra.mxu1 %v3097_v47  ;;  %v3156_v46 = vld [vmem:[#allocation4 + $0x264] ss:$16 sps:$4 sm:$0xff]   ;;  %v3159_v47 = vld [vmem:[#allocation4 + $0x26c] ss:$16 sps:$4 sm:$0xff]  }
 0x12e   :  { %1976 = vmatprep.subr.bf16.mxu0 %v3102_v49  ;;  %2058 = vmatprep.subr.bf16.mxu1 %v3105_v48  ;;  %v3154_v49 = vld [vmem:[#allocation4 + $0x260] ss:$16 sps:$4 sm:$0xff]   ;;  %v3157_v48 = vld [vmem:[#allocation4 + $0x268] ss:$16 sps:$4 sm:$0xff]  }
 0x131   :  { %1977 = vmatpush1.bf16.msra.mxu0 %v3100_v50  ;;  %2059 = vmatpush1.bf16.msra.mxu1 %v3103_v51  ;;  %v3162_v50 = vld [vmem:[#allocation4 + $0x284] ss:$16 sps:$4 sm:$0xff]   ;;  %v3165_v51 = vld [vmem:[#allocation4 + $0x28c] ss:$16 sps:$4 sm:$0xff]  }
 0x132   :  { %1978 = vmatprep.subr.bf16.mxu0 %v3108_v53  ;;  %2060 = vmatprep.subr.bf16.mxu1 %v3111_v54  ;;  %v3160_v53 = vld [vmem:[#allocation4 + $0x280] ss:$16 sps:$4 sm:$0xff]   ;;  %v3163_v54 = vld [vmem:[#allocation4 + $0x288] ss:$16 sps:$4 sm:$0xff]  }
 0x135   :  { %1979 = vmatpush1.bf16.msra.mxu0 %v3106_v55  ;;  %2061 = vmatpush1.bf16.msra.mxu1 %v3109_v56  ;;  %v3168_v55 = vld [vmem:[#allocation4 + $0x2a4] ss:$16 sps:$4 sm:$0xff]   ;;  %v3171_v56 = vld [vmem:[#allocation4 + $0x2ac] ss:$16 sps:$4 sm:$0xff]  }
 0x136   :  { %1980 = vmatprep.subr.bf16.mxu0 %v3114_v57  ;;  %2062 = vmatprep.subr.bf16.mxu1 %v3117_v58  ;;  %v3166_v57 = vld [vmem:[#allocation4 + $0x2a0] ss:$16 sps:$4 sm:$0xff]   ;;  %v3169_v58 = vld [vmem:[#allocation4 + $0x2a8] ss:$16 sps:$4 sm:$0xff]  }
 0x139   :  { %1981 = vmatpush1.bf16.msra.mxu0 %v3112_v59  ;;  %2063 = vmatpush1.bf16.msra.mxu1 %v3115_v60  ;;  %v3174_v59 = vld [vmem:[#allocation4 + $0x2c4] ss:$16 sps:$4 sm:$0xff]   ;;  %v3177_v60 = vld [vmem:[#allocation4 + $0x2cc] ss:$16 sps:$4 sm:$0xff]  }
 0x13a   :  { %1982 = vmatprep.subr.bf16.mxu0 %v3120_v61  ;;  %2064 = vmatprep.subr.bf16.mxu1 %v3123_v62  ;;  %v3172_v61 = vld [vmem:[#allocation4 + $0x2c0] ss:$16 sps:$4 sm:$0xff]   ;;  %v3175_v62 = vld [vmem:[#allocation4 + $0x2c8] ss:$16 sps:$4 sm:$0xff]  }
 0x13d   :  { %1983 = vmatpush1.bf16.msra.mxu0 %v3118_v63  ;;  %2065 = vmatpush1.bf16.msra.mxu1 %v3121_v1  ;;  %v3180_v63 = vld [vmem:[#allocation4 + $0x2e4] ss:$16 sps:$4 sm:$0xff]   ;;  %v3183_v1 = vld [vmem:[#allocation4 + $0x2ec] ss:$16 sps:$4 sm:$0xff]  }
 0x13e   :  { %1984 = vmatprep.subr.bf16.mxu0 %v3126_v2  ;;  %2066 = vmatprep.subr.bf16.mxu1 %v3129_v3  ;;  %v3178_v2 = vld [vmem:[#allocation4 + $0x2e0] ss:$16 sps:$4 sm:$0xff]   ;;  %v3181_v3 = vld [vmem:[#allocation4 + $0x2e8] ss:$16 sps:$4 sm:$0xff]  }
 0x141   :  { %1985 = vmatpush1.bf16.msra.mxu0 %v3124_v4  ;;  %2067 = vmatpush1.bf16.msra.mxu1 %v3127_v5  ;;  %v3186_v4 = vld [vmem:[#allocation4 + $0x304] ss:$16 sps:$4 sm:$0xff]   ;;  %v3189_v5 = vld [vmem:[#allocation4 + $0x30c] ss:$16 sps:$4 sm:$0xff]  }
 0x142   :  { %1986 = vmatprep.subr.bf16.mxu0 %v3132_v6  ;;  %2068 = vmatprep.subr.bf16.mxu1 %v3135_v7  ;;  %v3184_v6 = vld [vmem:[#allocation4 + $0x300] ss:$16 sps:$4 sm:$0xff]   ;;  %v3187_v7 = vld [vmem:[#allocation4 + $0x308] ss:$16 sps:$4 sm:$0xff]  }
 0x145   :  { %1987 = vmatpush1.bf16.msra.mxu0 %v3130_v8  ;;  %2069 = vmatpush1.bf16.msra.mxu1 %v3133_v9  ;;  %v3192_v8 = vld [vmem:[#allocation4 + $0x324] ss:$16 sps:$4 sm:$0xff]   ;;  %v3195_v9 = vld [vmem:[#allocation4 + $0x32c] ss:$16 sps:$4 sm:$0xff]  }
 0x146   :  { %1997 = vmatprep.subr.bf16.mxu0 %v3138_v10  ;;  %2079 = vmatprep.subr.bf16.mxu1 %v3141_v11  ;;  %v3190_v10 = vld [vmem:[#allocation4 + $0x320] ss:$16 sps:$4 sm:$0xff]   ;;  %v3193_v11 = vld [vmem:[#allocation4 + $0x328] ss:$16 sps:$4 sm:$0xff]  }
 0x1db   :  { %v1069_v19 = vpop.f32.mrb[0].mxu0  ;;  %v3515_v20 = vpop.f32.mrb[0].mxu1 }
 0x1dc   :  { %v2813_v21 = vadd.f32 %v1069_v19, %v337_v12  ;;  %v1071_v22 = vpop.f32.mrb[1].mxu0  ;;  %v1153_v23 = vpop.f32.mrb[1].mxu1  ;;  %v3198_v12 = vld [vmem:[#allocation4 + $0x344] ss:$16 sps:$4 sm:$0xff]   ;;  %v3199_v19 = vld [vmem:[#allocation4 + $0x348] ss:$16 sps:$4 sm:$0xff]  }
 0x1dd   :  { %v2814_v24 = vadd.f32 %v1071_v22, %v341_v15  ;;  %v2816_v25 = vadd.f32 %v1153_v23, %v349_v18  ;;  %v1073_v26 = vpop.f32.mrb[2].mxu0  ;;  %v1155_v27 = vpop.f32.mrb[2].mxu1  ;;  %v3201_v15 = vld [vmem:[#allocation4 + $0x34c] ss:$16 sps:$4 sm:$0xff]   ;;  %v3196_v18 = vld [vmem:[#allocation4 + $0x340] ss:$16 sps:$4 sm:$0xff]  }
 0x1de   :  { %v1158_v28 = vpack.c.bf16 %v2813_v21, %v2813_v21  ;;  %v1074_v29 = vpop.f32.mrb[3].mxu0  ;;  %v1156_v30 = vpop.f32.mrb[3].mxu1  ;;  %v3204_v21 = vld [vmem:[#allocation4 + $0x364] ss:$16 sps:$4 sm:$0xff]   ;;  %v3207_v22 = vld [vmem:[#allocation4 + $0x36c] ss:$16 sps:$4 sm:$0xff]  }
 0x1df   :  { %v1159_v31 = vpack.c.bf16 %v2814_v24, %v2814_v24  ;;  %v1161_v32 = vpack.c.bf16 %v2816_v25, %v2816_v25  ;;  %v3202_v23 = vld [vmem:[#allocation4 + $0x360] ss:$16 sps:$4 sm:$0xff]   ;;  %v3205_v24 = vld [vmem:[#allocation4 + $0x368] ss:$16 sps:$4 sm:$0xff]   ;;  %v3210_v25 = vld [vmem:[#allocation4 + $0x384] ss:$16 sps:$4 sm:$0xff]  }
 0x1e0   :  { %v1162_v36 = vmax.bf16 %v3341_v0, %v1158_v28  ;;  %v3213_v26 = vld [vmem:[#allocation4 + $0x38c] ss:$16 sps:$4 sm:$0xff]   ;;  %v3208_v27 = vld [vmem:[#allocation4 + $0x380] ss:$16 sps:$4 sm:$0xff]   ;;  %v3211_v28 = vld [vmem:[#allocation4 + $0x388] ss:$16 sps:$4 sm:$0xff]  }
 0x1e1   :  { %v1163_v33 = vmax.bf16 %v3341_v0, %v1159_v31  ;;  %v1165_v39 = vmax.bf16 %v3341_v0, %v1161_v32  ;;  %v3216_v29 = vld [vmem:[#allocation4 + $0x3a4] ss:$16 sps:$4 sm:$0xff]   ;;  %v3219_v30 = vld [vmem:[#allocation4 + $0x3ac] ss:$16 sps:$4 sm:$0xff]   ;;  %v3214_v31 = vld [vmem:[#allocation4 + $0x3a0] ss:$16 sps:$4 sm:$0xff]  }
 0x1e2   :  { %v3217_v32 = vld [vmem:[#allocation4 + $0x3a8] ss:$16 sps:$4 sm:$0xff]  }
 0x1e3   :  { %1988 = vmatprep.mubr.bf16.mxu0 %v1163_v33  ;;  %2070 = vmatprep.mubr.bf16.mxu1 %v1163_v33  ;;  %v345_v33 = vrot.slane %v3507_v52, %v3459_v14  ;;  %v3232_v52 = vld [vmem:[#allocation6 + $0x40] sm:$0xff]  }
 0x1e4   :  { %1989 = vmatmul.mubr.bf16.vlgmr.msra.gmra.mrb[4].mxu0 %v1162_v36  ;;  %2071 = vmatmul.mubr.bf16.vlgmr.msra.gmra.mrb[4].mxu1 %v1162_v36  ;;  %v3220_v36 = vld [vmem:[#allocation4 + $0x3c0] ss:$16 sps:$4 sm:$0xff]  }
 0x1e5   :  { %1998 = vmatpush1.bf16.msra.mxu0 %v3136_v34  ;;  %2080 = vmatpush1.bf16.msra.mxu1 %v3139_v35  ;;  %v3222_v34 = vld [vmem:[#allocation4 + $0x3c4] ss:$16 sps:$4 sm:$0xff]   ;;  %v3225_v35 = vld [vmem:[#allocation4 + $0x3cc] ss:$16 sps:$4 sm:$0xff]  }
 0x1e6   :  { %2029 = vmatprep.mubr.bf16.mxu0 %v1165_v39  ;;  %2111 = vmatprep.mubr.bf16.mxu1 %v1165_v39  ;;  %v3228_v39 = vld [vmem:[#allocation4 + $0x3e4] ss:$16 sps:$4 sm:$0xff]  }
 0x1e7   :  { %1999 = vmatprep.subr.bf16.mxu0 %v3144_v37  ;;  %2081 = vmatprep.subr.bf16.mxu1 %v3147_v38  ;;  %v3223_v37 = vld [vmem:[#allocation4 + $0x3c8] ss:$16 sps:$4 sm:$0xff]   ;;  %v2815_v38 = vadd.f32 %v3515_v20, %v345_v33 }
 0x1e8   :  { %v3236_v20 = vld [vmem:[#allocation6 + $0x48] sm:$0xff]  }
 0x1e9   :  { %2000 = vmatpush1.bf16.msra.mxu0 %v3142_v40  ;;  %2082 = vmatpush1.bf16.msra.mxu1 %v3145_v41  ;;  %v3231_v40 = vld [vmem:[#allocation4 + $0x3ec] ss:$16 sps:$4 sm:$0xff]   ;;  %v3226_v41 = vld [vmem:[#allocation4 + $0x3e0] ss:$16 sps:$4 sm:$0xff]  }
 0x1ea   :  { %2001 = vmatprep.subr.bf16.mxu0 %v3150_v42  ;;  %2083 = vmatprep.subr.bf16.mxu1 %v3153_v43  ;;  %v3229_v42 = vld [vmem:[#allocation4 + $0x3e8] ss:$16 sps:$4 sm:$0xff]   ;;  %v1160_v43 = vpack.c.bf16 %v2815_v38, %v2815_v38 }
 0x1ed   :  { %2002 = vmatpush1.bf16.msra.mxu0 %v3148_v44  ;;  %2084 = vmatpush1.bf16.msra.mxu1 %v3151_v45  ;;  %v3233_v44 = vld [vmem:[#allocation6 + $0xc0] sm:$0xff]  }
 0x1ee   :  { %2003 = vmatprep.subr.bf16.mxu0 %v3156_v46  ;;  %2085 = vmatprep.subr.bf16.mxu1 %v3159_v47  ;;  %v3234_v45 = vld [vmem:[#allocation6] sm:$0xff]   ;;  %v1164_v47 = vmax.bf16 %v3341_v0, %v1160_v43 }
 0x1ef   :  { %v3235_v46 = vld [vmem:[#allocation6 + $0x80] sm:$0xff]  }
 0x1f1   :  { %2004 = vmatpush1.bf16.msra.mxu0 %v3154_v49  ;;  %2086 = vmatpush1.bf16.msra.mxu1 %v3157_v48  ;;  %v3237_v49 = vld [vmem:[#allocation6 + $0xc8] sm:$0xff]  }
 0x1f2   :  { %2005 = vmatprep.subr.bf16.mxu0 %v3162_v50  ;;  %2087 = vmatprep.subr.bf16.mxu1 %v3165_v51  ;;  %v3238_v48 = vld [vmem:[#allocation6 + $0x8] sm:$0xff]   ;;  %v3240_v51 = vld [vmem:[#allocation6 + $0x50] sm:$0xff]  }
 0x1f3   :  { %v3239_v50 = vld [vmem:[#allocation6 + $0x88] sm:$0xff]  }
 0x1f5   :  { %2006 = vmatpush1.bf16.msra.mxu0 %v3160_v53  ;;  %2088 = vmatpush1.bf16.msra.mxu1 %v3163_v54  ;;  %v3241_v53 = vld [vmem:[#allocation6 + $0xd0] sm:$0xff]  }
 0x1f6   :  { %2007 = vmatprep.subr.bf16.mxu0 %v3168_v55  ;;  %2089 = vmatprep.subr.bf16.mxu1 %v3171_v56  ;;  %v3242_v54 = vld [vmem:[#allocation6 + $0x10] sm:$0xff]   ;;  %v3244_v56 = vld [vmem:[#allocation6 + $0x58] sm:$0xff]  }
 0x1f7   :  { %v3243_v55 = vld [vmem:[#allocation6 + $0x90] sm:$0xff]  }
 0x1f9   :  { %2008 = vmatpush1.bf16.msra.mxu0 %v3166_v57  ;;  %2090 = vmatpush1.bf16.msra.mxu1 %v3169_v58  ;;  %v3245_v57 = vld [vmem:[#allocation6 + $0xd8] sm:$0xff]  }
 0x1fa   :  { %2009 = vmatprep.subr.bf16.mxu0 %v3174_v59  ;;  %2091 = vmatprep.subr.bf16.mxu1 %v3177_v60  ;;  %v3246_v58 = vld [vmem:[#allocation6 + $0x18] sm:$0xff]   ;;  %v3248_v60 = vld [vmem:[#allocation6 + $0x60] sm:$0xff]  }
 0x1fb   :  { %v3247_v59 = vld [vmem:[#allocation6 + $0x98] sm:$0xff]  }
 0x1fd   :  { %2010 = vmatpush1.bf16.msra.mxu0 %v3172_v61  ;;  %2092 = vmatpush1.bf16.msra.mxu1 %v3175_v62  ;;  %v3249_v61 = vld [vmem:[#allocation6 + $0xe0] sm:$0xff]  }
 0x1fe   :  { %2011 = vmatprep.subr.bf16.mxu0 %v3180_v63  ;;  %2093 = vmatprep.subr.bf16.mxu1 %v3183_v1  ;;  %v3250_v62 = vld [vmem:[#allocation6 + $0x20] sm:$0xff]   ;;  %v3252_v1 = vld [vmem:[#allocation6 + $0x68] sm:$0xff]  }
 0x1ff   :  { %v3251_v63 = vld [vmem:[#allocation6 + $0xa0] sm:$0xff]  }
 0x201   :  { %2012 = vmatpush1.bf16.msra.mxu0 %v3178_v2  ;;  %2094 = vmatpush1.bf16.msra.mxu1 %v3181_v3  ;;  %v3253_v2 = vld [vmem:[#allocation6 + $0xe8] sm:$0xff]  }
 0x202   :  { %2013 = vmatprep.subr.bf16.mxu0 %v3186_v4  ;;  %2095 = vmatprep.subr.bf16.mxu1 %v3189_v5  ;;  %v3254_v3 = vld [vmem:[#allocation6 + $0x28] sm:$0xff]   ;;  %v3256_v5 = vld [vmem:[#allocation6 + $0x70] sm:$0xff]  }
 0x203   :  { %v3255_v4 = vld [vmem:[#allocation6 + $0xa8] sm:$0xff]  }
 0x205   :  { %2014 = vmatpush1.bf16.msra.mxu0 %v3184_v6  ;;  %2096 = vmatpush1.bf16.msra.mxu1 %v3187_v7  ;;  %v3257_v6 = vld [vmem:[#allocation6 + $0xf0] sm:$0xff]  }
 0x206   :  { %2015 = vmatprep.subr.bf16.mxu0 %v3192_v8  ;;  %2097 = vmatprep.subr.bf16.mxu1 %v3195_v9  ;;  %v3258_v7 = vld [vmem:[#allocation6 + $0x30] sm:$0xff]   ;;  %v3260_v9 = vld [vmem:[#allocation6 + $0x78] sm:$0xff]  }
 0x207   :  { %v3259_v8 = vld [vmem:[#allocation6 + $0xb0] sm:$0xff]  }
 0x209   :  { %2016 = vmatpush1.bf16.msra.mxu0 %v3190_v10  ;;  %2098 = vmatpush1.bf16.msra.mxu1 %v3193_v11  ;;  %v3261_v10 = vld [vmem:[#allocation6 + $0xf8] sm:$0xff]  }
 0x20a   :  { %2017 = vmatprep.subr.bf16.mxu0 %v3198_v12  ;;  %2099 = vmatprep.subr.bf16.mxu1 %v3201_v15  ;;  %v3262_v11 = vld [vmem:[#allocation6 + $0x38] sm:$0xff]   ;;  %v1294_v15 = vld [vmem:[%s3547_s6] sm:$0xf] }
 0x20b   :  { %v3263_v12 = vld [vmem:[#allocation6 + $0xb8] sm:$0xff]  }
 0x20d   :  { %2018 = vmatpush1.bf16.msra.mxu0 %v3196_v18  ;;  %2100 = vmatpush1.bf16.msra.mxu1 %v3199_v19  ;;  %v1299_v18 = vrot.slane %v1294_v15, %v3456_v13  ;;  %v1307_v19 = vrot.slane %v1294_v15, %v3459_v14 }
 0x20e   :  { %2019 = vmatprep.subr.bf16.mxu0 %v3204_v21  ;;  %2101 = vmatprep.subr.bf16.mxu1 %v3207_v22  ;;  %v1303_v21 = vrot.slane %v1294_v15, %v3463_v16  ;;  %v1311_v22 = vrot.slane %v1294_v15, %v3466_v17 }
 0x211   :  { %2020 = vmatpush1.bf16.msra.mxu0 %v3202_v23  ;;  %2102 = vmatpush1.bf16.msra.mxu1 %v3205_v24 }
 0x212   :  { %2021 = vmatprep.subr.bf16.mxu0 %v3210_v25  ;;  %2103 = vmatprep.subr.bf16.mxu1 %v3213_v26 }
 0x215   :  { %2022 = vmatpush1.bf16.msra.mxu0 %v3208_v27  ;;  %2104 = vmatpush1.bf16.msra.mxu1 %v3211_v28 }
 0x216   :  { %2023 = vmatprep.subr.bf16.mxu0 %v3216_v29  ;;  %2105 = vmatprep.subr.bf16.mxu1 %v3219_v30 }
 0x219   :  { %2024 = vmatpush1.bf16.msra.mxu0 %v3214_v31  ;;  %2106 = vmatpush1.bf16.msra.mxu1 %v3217_v32 }
 0x21a   :  { %2025 = vmatprep.subr.bf16.mxu0 %v3222_v34  ;;  %2107 = vmatprep.subr.bf16.mxu1 %v3225_v35 }
 0x21d   :  { %2026 = vmatpush1.bf16.msra.mxu0 %v3220_v36  ;;  %2108 = vmatpush1.bf16.msra.mxu1 %v3223_v37 }
 0x21e   :  { %2027 = vmatprep.subr.bf16.mxu0 %v3228_v39  ;;  %2109 = vmatprep.subr.bf16.mxu1 %v3231_v40 }
 0x221   :  { %2028 = vmatpush1.bf16.msra.mxu0 %v3226_v41  ;;  %2110 = vmatpush1.bf16.msra.mxu1 %v3229_v42 }
 0x222   :  { %2769 = vmatprep.subr.bf16.mxu0 %v3232_v52  ;;  %2791 = vmatprep.subr.bf16.mxu1 %v3233_v44 }
 0x224   :  { %2030 = vmatmul.mubr.bf16.vlgmr.msra.gmra.mrb[4].mxu0 %v1164_v47  ;;  %2112 = vmatmul.mubr.bf16.vlgmr.msra.gmra.mrb[4].mxu1 %v1164_v47 }
 0x225   :  { %2770 = vmatpush3.bf16.msra.mxu0 %v3234_v45  ;;  %2792 = vmatpush3.bf16.msra.mxu1 %v3235_v46  ;;  %v2768_v46 = vld [vmem:[%s3549_s8] ss:$0 sm:$0xff] }
 0x226   :  { %2771 = vmatprep.subr.bf16.mxu0 %v3236_v20  ;;  %2793 = vmatprep.subr.bf16.mxu1 %v3237_v49 }
 0x229   :  { %2772 = vmatpush3.bf16.msra.mxu0 %v3238_v48  ;;  %2794 = vmatpush3.bf16.msra.mxu1 %v3239_v50 }
 0x22a   :  { %2773 = vmatprep.subr.bf16.mxu0 %v3240_v51  ;;  %2795 = vmatprep.subr.bf16.mxu1 %v3241_v53 }
 0x22d   :  { %2774 = vmatpush3.bf16.msra.mxu0 %v3242_v54  ;;  %2796 = vmatpush3.bf16.msra.mxu1 %v3243_v55 }
 0x22e   :  { %2775 = vmatprep.subr.bf16.mxu0 %v3244_v56  ;;  %2797 = vmatprep.subr.bf16.mxu1 %v3245_v57 }
 0x231   :  { %2776 = vmatpush3.bf16.msra.mxu0 %v3246_v58  ;;  %2798 = vmatpush3.bf16.msra.mxu1 %v3247_v59 }
 0x232   :  { %2777 = vmatprep.subr.bf16.mxu0 %v3248_v60  ;;  %2799 = vmatprep.subr.bf16.mxu1 %v3249_v61 }
 0x235   :  { %2778 = vmatpush3.bf16.msra.mxu0 %v3250_v62  ;;  %2800 = vmatpush3.bf16.msra.mxu1 %v3251_v63 }
 0x236   :  { %2779 = vmatprep.subr.bf16.mxu0 %v3252_v1  ;;  %2801 = vmatprep.subr.bf16.mxu1 %v3253_v2 }
 0x239   :  { %2780 = vmatpush3.bf16.msra.mxu0 %v3254_v3  ;;  %2802 = vmatpush3.bf16.msra.mxu1 %v3255_v4 }
 0x23a   :  { %2781 = vmatprep.subr.bf16.mxu0 %v3256_v5  ;;  %2803 = vmatprep.subr.bf16.mxu1 %v3257_v6 }
 0x23d   :  { %2782 = vmatpush3.bf16.msra.mxu0 %v3258_v7  ;;  %2804 = vmatpush3.bf16.msra.mxu1 %v3259_v8 }
 0x23e   :  { %2783 = vmatprep.subr.bf16.mxu0 %v3260_v9  ;;  %2805 = vmatprep.subr.bf16.mxu1 %v3261_v10 }
 0x241   :  { %2784 = vmatpush3.bf16.msra.mxu0 %v3262_v11  ;;  %2806 = vmatpush3.bf16.msra.mxu1 %v3263_v12 }
 0x2f7   :  { %v2031_v23 = vpop.f32.mrb[4].mxu0  ;;  %v2113_v24 = vpop.f32.mrb[4].mxu1 }
 0x2f8   :  { %v2817_v25 = vadd.f32 %v2031_v23, %v1299_v18  ;;  %v2819_v26 = vadd.f32 %v2113_v24, %v1307_v19  ;;  %v2033_v27 = vpop.f32.mrb[5].mxu0  ;;  %v2115_v28 = vpop.f32.mrb[5].mxu1 }
 0x2f9   :  { %v2818_v29 = vadd.f32 %v2033_v27, %v1303_v21  ;;  %v2820_v30 = vadd.f32 %v2115_v28, %v1311_v22  ;;  %v2035_v31 = vpop.f32.mrb[6].mxu0  ;;  %v2117_v32 = vpop.f32.mrb[6].mxu1 }
 0x2fa   :  { %v2120_v33 = vpack.c.bf16 %v2817_v25, %v2817_v25  ;;  %v2122_v34 = vpack.c.bf16 %v2819_v26, %v2819_v26  ;;  %v2036_v35 = vpop.f32.mrb[7].mxu0  ;;  %v2118_v13 = vpop.f32.mrb[7].mxu1 }
 0x2fb   :  { %v2121_v36 = vpack.c.bf16 %v2818_v29, %v2818_v29  ;;  %v2123_v14 = vpack.c.bf16 %v2820_v30, %v2820_v30 }
 0x2fc   :  { %v2124_v37 = vmax.bf16 %v3341_v0, %v2120_v33  ;;  %v2126_v38 = vmax.bf16 %v3341_v0, %v2122_v34 }
 0x2fd   :  { %v2125_v16 = vmax.bf16 %v3341_v0, %v2121_v36  ;;  %v2127_v17 = vmax.bf16 %v3341_v0, %v2123_v14 }
 0x2ff   :  { %2416 = vmatprep.mubr.bf16.mxu0 %v2125_v16  ;;  %2456 = vmatprep.mubr.bf16.mxu1 %v2127_v17 }
 0x300   :  { %2417 = vmatmul.mubr.bf16.vlgmr.msra.gmra.mrb[8].mxu0 %v2124_v37  ;;  %2457 = vmatmul.mubr.bf16.vlgmr.msra.gmra.mrb[8].mxu1 %v2126_v38 }
 0x3d3   :  { %v2785_v39 = vpop.f32.mrb[8].mxu0  ;;  %v2807_v40 = vpop.f32.mrb[8].mxu1 }
 0x3d4   :  { %v2786_v41 = vpop.f32.mrb[9].mxu0  ;;  %v2808_v42 = vpop.f32.mrb[9].mxu1 }
 0x3d5   :  { %v2787_v43 = vadd.f32 %v2786_v41, %v2785_v39  ;;  %v2809_v52 = vadd.f32 %v2808_v42, %v2807_v40  ;;  %v2788_v44 = vpop.f32.mrb[10].mxu0  ;;  %v2810_v45 = vpop.f32.mrb[10].mxu1 }
 0x3d6   :  { %v2789_v47 = vpop.f32.mrb[11].mxu0  ;;  %v2811_v20 = vpop.f32.mrb[11].mxu1 }
 0x3d7   :  { %v2459_v49 = vadd.f32 %v2809_v52, %v2787_v43 }
 0x3d9   :  { %v2471_v0 = vadd.f32 %v2768_v46, %v2459_v49 }
 0x3db   :  { %2473 = vst.msk [vmem:[%s3550_s9] sm:$0xff] %vm2472_vm0, %v2471_v0 }
 0x3dc   :  { %2478 = vsyncpa [#allocation3], 1 }
 0x3dd   :  { %2479 = vsyncpa [#allocation5], 1 }

</bundles_post_ra>
